<compile_context>
chip_gen: v7x
topology: tpu7x:2x2x1
jax: 0.10.0
libtpu: 0.0.40
codegen_flags: <defaults>
</compile_context>

<pallas_src>
import math
import functools

import jax
import jax.numpy as jnp
from jax import lax
from jax.experimental import pallas as pl
from jax.experimental.pallas import tpu as pltpu  # noqa: F401  (TPU backend)


# ------------------------------ model config --------------------------------

EMBED = 32
HEADS = 4
HEAD_DIM = EMBED // HEADS
FWD_EXP = 4
NUM_LAYERS = 2
MAX_LEN = 16
SRC_VOCAB = 37
TGT_VOCAB = 41
SRC_PAD = 0
TGT_PAD = 0

_NEG = -1e30  # masked_fill(-inf) surrogate (finite, avoids NaN on masked rows)


# --------------------------- in-kernel helpers -------------------------------
# These are plain jnp functions traced inside the Pallas kernels (no HBM I/O).

def _layernorm(x, g, b):
    # PyTorch LayerNorm: eps=1e-5, biased variance; stats in f32.
    mean = jnp.mean(x, axis=-1, keepdims=True)
    var = jnp.mean((x - mean) ** 2, axis=-1, keepdims=True)
    inv = lax.rsqrt(var + 1e-5)
    return (x - mean) * inv * g + b


def _attention(q2, kv2, kmask, wq_bd, wkv_bd, wo, bo, N, Lq, Lk,
               *, heads, head_dim, scale, causal):
    """Multi-head attention on flat activations.

    q2:  (N*Lq, E) f32      kv2: (N*Lk, E) f32
    kmask: (N, Lk) f32 (1 = valid key, 0 = pad)
    wq_bd: (E, E) bf16 block-diag; wkv_bd: (E, 2E) bf16 block-diag [K | V]
    wo: (E, E) bf16; bo: (1, E) f32
    returns (N*Lq, E) f32 (after output projection, before residual).
    """
    E = heads * head_dim

    # fused per-head projections (shared weight across heads, no bias)
    q = jnp.dot(q2.astype(jnp.bfloat16), wq_bd,
                preferred_element_type=jnp.float32)                  # (N*Lq, E)
    kv = jnp.dot(kv2.astype(jnp.bfloat16), wkv_bd,
                 preferred_element_type=jnp.float32)                 # (N*Lk, 2E)
    k = kv[:, :E]
    v = kv[:, E:]

    def split_heads(x2, L):
        # (N*L, E) -> (H*N, L, d); batch index = h*N + n
        return jnp.concatenate(
            [x2[:, h * head_dim:(h + 1) * head_dim].reshape(N, L, head_dim)
             for h in range(heads)],
            axis=0)

    q3 = split_heads(q, Lq)
    k3 = split_heads(k, Lk)
    v3 = split_heads(v, Lk)

    # batched scores over all (head, batch) pairs in one einsum
    s = jnp.einsum('bqd,bkd->bqk',
                   q3.astype(jnp.bfloat16), k3.astype(jnp.bfloat16),
                   preferred_element_type=jnp.float32)               # (H*N, Lq, Lk)

    # additive mask bias built in-register (no HBM mask array)
    pad_bias = jnp.where(kmask > 0.5, 0.0, _NEG)                     # (N, Lk)
    bias = jnp.broadcast_to(pad_bias[:, None, :], (N, Lq, Lk))
    if causal:
        row = lax.broadcasted_iota(jnp.int32, (Lq, Lk), 0)
        col = lax.broadcasted_iota(jnp.int32, (Lq, Lk), 1)
        bias = bias + jnp.where(col <= row, 0.0, _NEG)[None, :, :]
    bias = jnp.concatenate([bias] * heads, axis=0)                   # (H*N, Lq, Lk)

    # softmax(energy / sqrt(EMBED)) with masked_fill semantics (f32 stats)
    s = (s + bias) * scale
    s = s - jnp.max(s, axis=-1, keepdims=True)
    p = jnp.exp(s)
    p = p * pl.reciprocal(jnp.sum(p, axis=-1, keepdims=True), approx=True)

    ctx3 = jnp.einsum('bqk,bkd->bqd',
                      p.astype(jnp.bfloat16), v3.astype(jnp.bfloat16),
                      preferred_element_type=jnp.float32)            # (H*N, Lq, d)

    # merge heads back to (N*Lq, E)
    ctx = jnp.concatenate(
        [ctx3[h * N:(h + 1) * N].reshape(N * Lq, head_dim) for h in range(heads)],
        axis=1)

    return jnp.dot(ctx.astype(jnp.bfloat16), wo,
                   preferred_element_type=jnp.float32) + bo


# ------------------------------ Pallas kernels -------------------------------

def attn_ln_kernel(qin_ref, kvin_ref, kmask_ref,
                   wq_ref, wkv_ref, wo_ref, bo_ref,
                   g_ref, b_ref, o_ref,
                   *, heads, head_dim, scale, causal):
    # fused: LayerNorm(attention(q, kv, kv) + q)
    N, Lq, E = qin_ref.shape
    Lk = kvin_ref.shape[1]
    q2 = qin_ref[...].reshape(N * Lq, E)
    kv2 = kvin_ref[...].reshape(N * Lk, E)
    attn = _attention(q2, kv2, kmask_ref[...], wq_ref[...], wkv_ref[...],
                      wo_ref[...], bo_ref[...], N, Lq, Lk,
                      heads=heads, head_dim=head_dim, scale=scale, causal=causal)
    o_ref[...] = _layernorm(attn + q2, g_ref[...], b_ref[...]).reshape(N, Lq, E)


def transformer_block_kernel(qin_ref, kvin_ref, kmask_ref,
                             wq_ref, wkv_ref, wo_ref, bo_ref,
                             ln1g_ref, ln1b_ref,
                             w1_ref, b1_ref, w2_ref, b2_ref,
                             ln2g_ref, ln2b_ref, o_ref,
                             *, heads, head_dim, scale, causal):
    # fused: x = LN1(attn(q, kv, kv) + q); out = LN2(FFN(x) + x)
    N, Lq, E = qin_ref.shape
    Lk = kvin_ref.shape[1]
    q2 = qin_ref[...].reshape(N * Lq, E)
    kv2 = kvin_ref[...].reshape(N * Lk, E)

    attn = _attention(q2, kv2, kmask_ref[...], wq_ref[...], wkv_ref[...],
                      wo_ref[...], bo_ref[...], N, Lq, Lk,
                      heads=heads, head_dim=head_dim, scale=scale, causal=causal)
    x = _layernorm(attn + q2, ln1g_ref[...], ln1b_ref[...])

    h = jnp.dot(x.astype(jnp.bfloat16), w1_ref[...],
                preferred_element_type=jnp.float32) + b1_ref[...]
    h = jnp.maximum(h, 0.0)
    y = jnp.dot(h.astype(jnp.bfloat16), w2_ref[...],
                preferred_element_type=jnp.float32) + b2_ref[...]

    o_ref[...] = _layernorm(y + x, ln2g_ref[...], ln2b_ref[...]).reshape(N, Lq, E)


def linear_kernel(x_ref, w_ref, b_ref, o_ref):
    # y = x @ W + b   (final vocab projection)
    o_ref[...] = jnp.dot(x_ref[...].astype(jnp.bfloat16), w_ref[...],
                         preferred_element_type=jnp.float32) + b_ref[...]


# ----------------------------- kernel wrappers -------------------------------

def _fs(shape):
    n = len(shape)
    return pl.BlockSpec(shape, lambda: (0,) * n)


def attn_ln_call(attn_p, g, b, q_in, kv_in, kmask, *, causal):
    N, Lq, E = q_in.shape
    kern = functools.partial(attn_ln_kernel, heads=HEADS, head_dim=HEAD_DIM,
                             scale=1.0 / math.sqrt(EMBED), causal=causal)
    args = (q_in, kv_in, kmask,
            attn_p["wq_bd"], attn_p["wkv_bd"], attn_p["wo"], attn_p["bo"],
            g, b)
    return pl.pallas_call(
        kern,
        out_shape=jax.ShapeDtypeStruct((N, Lq, E), jnp.float32),
        in_specs=[_fs(a.shape) for a in args],
        out_specs=_fs((N, Lq, E)),
    )(*args)


def transformer_block_call(p, q_in, kv_in, kmask, *, causal=False):
    N, Lq, E = q_in.shape
    kern = functools.partial(transformer_block_kernel, heads=HEADS,
                             head_dim=HEAD_DIM, scale=1.0 / math.sqrt(EMBED),
                             causal=causal)
    a = p["attn"]
    args = (q_in, kv_in, kmask,
            a["wq_bd"], a["wkv_bd"], a["wo"], a["bo"],
            p["ln1_g"], p["ln1_b"],
            p["w1"], p["b1"], p["w2"], p["b2"],
            p["ln2_g"], p["ln2_b"])
    return pl.pallas_call(
        kern,
        out_shape=jax.ShapeDtypeStruct((N, Lq, E), jnp.float32),
        in_specs=[_fs(x.shape) for x in args],
        out_specs=_fs((N, Lq, E)),
    )(*args)


def linear_call(x2d, w, b):
    M, K = x2d.shape
    N = w.shape[1]
    return pl.pallas_call(
        linear_kernel,
        out_shape=jax.ShapeDtypeStruct((M, N), jnp.float32),
        in_specs=[_fs((M, K)), _fs((K, N)), _fs((1, N))],
        out_specs=_fs((M, N)),
    )(x2d, w, b)


# ----------------------------- model (glue in JAX) ---------------------------
# TODO(synk): embedding gather (token lookup) stays in XLA glue (jnp.take);
# there is no benefit to a Pallas gather at these sizes.

def encoder(p, src_tokens, src_kmask):
    N, L = src_tokens.shape
    out = jnp.take(p["word"], src_tokens, axis=0) + p["pos"][None, :L, :]
    for lp in p["layers"]:
        out = transformer_block_call(lp, out, out, src_kmask, causal=False)
    return out


def decoder(p, tgt_tokens, enc_out, src_kmask):
    N, L = tgt_tokens.shape
    x = jnp.take(p["word"], tgt_tokens, axis=0) + p["pos"][None, :L, :]
    ones_kmask = jnp.ones((N, L), jnp.float32)  # target mask is causal-only
    for lp in p["layers"]:
        query = attn_ln_call(lp["attn"], lp["ln_g"], lp["ln_b"],
                             x, x, ones_kmask, causal=True)
        x = transformer_block_call(lp["tb"], query, enc_out, src_kmask,
                                   causal=False)
    out = linear_call(x.reshape(-1, EMBED), p["w_out"], p["b_out"])
    return out.reshape(N, L, TGT_VOCAB)


def transformer_forward(params, source, target):
    src_kmask = (source != SRC_PAD).astype(jnp.float32)   # (N, Ls) key-pad mask
    enc = encoder(params["enc"], source, src_kmask)
    return decoder(params["dec"], target, enc, src_kmask)


# --------------------------- deterministic params ----------------------------

def init_params(key):
    keys = iter(jax.random.split(key, 256))

    def nrm(shape):
        return jax.random.normal(next(keys), shape, jnp.float32) * 0.02

    eye_h = jnp.eye(HEADS, dtype=jnp.float32)

    def init_attn():
        wq = nrm((HEAD_DIM, HEAD_DIM))
        wk = nrm((HEAD_DIM, HEAD_DIM))
        wv = nrm((HEAD_DIM, HEAD_DIM))
        wq_bd = jnp.kron(eye_h, wq)                       # (E, E) block-diag
        wk_bd = jnp.kron(eye_h, wk)
        wv_bd = jnp.kron(eye_h, wv)
        return {
            "wq_bd": wq_bd.astype(jnp.bfloat16),
            "wkv_bd": jnp.concatenate([wk_bd, wv_bd], axis=1).astype(jnp.bfloat16),
            "wo": nrm((EMBED, EMBED)).astype(jnp.bfloat16),
            "bo": jnp.zeros((1, EMBED), jnp.float32),
        }

    def init_tblock():
        return {
            "attn": init_attn(),
            "ln1_g": jnp.ones((1, EMBED), jnp.float32),
            "ln1_b": jnp.zeros((1, EMBED), jnp.float32),
            "w1": nrm((EMBED, FWD_EXP * EMBED)).astype(jnp.bfloat16),
            "b1": jnp.zeros((1, FWD_EXP * EMBED), jnp.float32),
            "w2": nrm((FWD_EXP * EMBED, EMBED)).astype(jnp.bfloat16),
            "b2": jnp.zeros((1, EMBED), jnp.float32),
            "ln2_g": jnp.ones((1, EMBED), jnp.float32),
            "ln2_b": jnp.zeros((1, EMBED), jnp.float32),
        }

    def init_dblock():
        return {
            "attn": init_attn(),
            "ln_g": jnp.ones((1, EMBED), jnp.float32),
            "ln_b": jnp.zeros((1, EMBED), jnp.float32),
            "tb": init_tblock(),
        }

    enc = {
        "word": nrm((SRC_VOCAB, EMBED)),
        "pos": nrm((MAX_LEN, EMBED)),
        "layers": [init_tblock() for _ in range(NUM_LAYERS)],
    }
    dec = {
        "word": nrm((TGT_VOCAB, EMBED)),
        "pos": nrm((MAX_LEN, EMBED)),
        "layers": [init_dblock() for _ in range(NUM_LAYERS)],
        "w_out": nrm((EMBED, TGT_VOCAB)).astype(jnp.bfloat16),
        "b_out": jnp.zeros((1, TGT_VOCAB), jnp.float32),
    }
    return {"enc": enc, "dec": dec}


# ----------------------------------- main ------------------------------------

if __name__ == "__main__":
    key = jax.random.PRNGKey(0)
    pkey, skey, tkey = jax.random.split(key, 3)
    params = init_params(pkey)

    N, SRC_LEN, TGT_LEN = 2, 8, 8
    # tokens in [1, vocab) so no row is entirely padding; add a trailing pad in source
    source = jax.random.randint(skey, (N, SRC_LEN), 1, SRC_VOCAB, dtype=jnp.int32)
    source = source.at[:, -1].set(SRC_PAD)
    target = jax.random.randint(tkey, (N, TGT_LEN), 1, TGT_VOCAB, dtype=jnp.int32)

    fwd = jax.jit(transformer_forward)
    out = jax.block_until_ready(fwd(params, source, target))

    assert out.shape == (N, TGT_LEN, TGT_VOCAB), out.shape
    assert bool(jnp.all(jnp.isfinite(out)))
    print("KERNEL_OK")
</pallas_src>

<mosaic_0001>
module attributes {stable_mosaic.version = 11 : i64} {
  func.func @transformer_block_kernel(%arg0: memref<2x8x32xf32, #tpu.memory_space<vmem>>, %arg1: memref<2x8x32xf32, #tpu.memory_space<vmem>>, %arg2: memref<2x8xf32, #tpu.memory_space<vmem>>, %arg3: memref<32x32xbf16, #tpu.memory_space<vmem>>, %arg4: memref<32x64xbf16, #tpu.memory_space<vmem>>, %arg5: memref<32x32xbf16, #tpu.memory_space<vmem>>, %arg6: memref<1x32xf32, #tpu.memory_space<vmem>>, %arg7: memref<1x32xf32, #tpu.memory_space<vmem>>, %arg8: memref<1x32xf32, #tpu.memory_space<vmem>>, %arg9: memref<32x128xbf16, #tpu.memory_space<vmem>>, %arg10: memref<1x128xf32, #tpu.memory_space<vmem>>, %arg11: memref<128x32xbf16, #tpu.memory_space<vmem>>, %arg12: memref<1x32xf32, #tpu.memory_space<vmem>>, %arg13: memref<1x32xf32, #tpu.memory_space<vmem>>, %arg14: memref<1x32xf32, #tpu.memory_space<vmem>>, %arg15: memref<2x8x32xf32, #tpu.memory_space<vmem>>) attributes {dimension_semantics = [], scalar_prefetch = 0 : i64, scratch_operands = 0 : i64, tpu.core_type = #tpu.core_type<tc>} {
    %c0 = arith.constant 0 : index
    %c0_0 = arith.constant 0 : index
    %c0_1 = arith.constant 0 : index
    %0 = vector.load %arg0[%c0, %c0_0, %c0_1] : memref<2x8x32xf32, #tpu.memory_space<vmem>>, vector<2x8x32xf32>
    %1 = vector.shape_cast %0 : vector<2x8x32xf32> to vector<16x32xf32>
    %c0_2 = arith.constant 0 : index
    %c0_3 = arith.constant 0 : index
    %c0_4 = arith.constant 0 : index
    %2 = vector.load %arg1[%c0_2, %c0_3, %c0_4] : memref<2x8x32xf32, #tpu.memory_space<vmem>>, vector<2x8x32xf32>
    %3 = vector.shape_cast %2 : vector<2x8x32xf32> to vector<16x32xf32>
    %c0_5 = arith.constant 0 : index
    %c0_6 = arith.constant 0 : index
    %4 = vector.load %arg2[%c0_5, %c0_6] : memref<2x8xf32, #tpu.memory_space<vmem>>, vector<2x8xf32>
    %c0_7 = arith.constant 0 : index
    %c0_8 = arith.constant 0 : index
    %5 = vector.load %arg3[%c0_7, %c0_8] : memref<32x32xbf16, #tpu.memory_space<vmem>>, vector<32x32xbf16>
    %c0_9 = arith.constant 0 : index
    %c0_10 = arith.constant 0 : index
    %6 = vector.load %arg4[%c0_9, %c0_10] : memref<32x64xbf16, #tpu.memory_space<vmem>>, vector<32x64xbf16>
    %c0_11 = arith.constant 0 : index
    %c0_12 = arith.constant 0 : index
    %7 = vector.load %arg5[%c0_11, %c0_12] : memref<32x32xbf16, #tpu.memory_space<vmem>>, vector<32x32xbf16>
    %c0_13 = arith.constant 0 : index
    %c0_14 = arith.constant 0 : index
    %8 = vector.load %arg6[%c0_13, %c0_14] : memref<1x32xf32, #tpu.memory_space<vmem>>, vector<1x32xf32>
    %9 = arith.truncf %1 : vector<16x32xf32> to vector<16x32xbf16>
    %cst = arith.constant dense<0.000000e+00> : vector<16x32xf32>
    %10 = tpu.matmul %9, %5, %cst {dimension_numbers = #tpu.dot_dimension_numbers<[1], [0], [0], [1], [0, 0, 1, 1], [], []>} : vector<16x32xbf16>, vector<32x32xbf16>, vector<16x32xf32> -> vector<16x32xf32>
    %11 = arith.truncf %3 : vector<16x32xf32> to vector<16x32xbf16>
    %cst_15 = arith.constant dense<0.000000e+00> : vector<16x64xf32>
    %12 = tpu.matmul %11, %6, %cst_15 {dimension_numbers = #tpu.dot_dimension_numbers<[1], [0], [0], [1], [0, 0, 1, 1], [], []>} : vector<16x32xbf16>, vector<32x64xbf16>, vector<16x64xf32> -> vector<16x64xf32>
    %13 = vector.extract_strided_slice %12 {offsets = [0, 0], sizes = [16, 32], strides = [1, 1]} : vector<16x64xf32> to vector<16x32xf32>
    %14 = vector.extract_strided_slice %12 {offsets = [0, 32], sizes = [16, 32], strides = [1, 1]} : vector<16x64xf32> to vector<16x32xf32>
    %15 = vector.extract_strided_slice %10 {offsets = [0, 0], sizes = [16, 8], strides = [1, 1]} : vector<16x32xf32> to vector<16x8xf32>
    %16 = vector.shape_cast %15 : vector<16x8xf32> to vector<2x8x8xf32>
    %17 = vector.extract_strided_slice %10 {offsets = [0, 8], sizes = [16, 8], strides = [1, 1]} : vector<16x32xf32> to vector<16x8xf32>
    %18 = vector.shape_cast %17 : vector<16x8xf32> to vector<2x8x8xf32>
    %19 = vector.extract_strided_slice %10 {offsets = [0, 16], sizes = [16, 8], strides = [1, 1]} : vector<16x32xf32> to vector<16x8xf32>
    %20 = vector.shape_cast %19 : vector<16x8xf32> to vector<2x8x8xf32>
    %21 = vector.extract_strided_slice %10 {offsets = [0, 24], sizes = [16, 8], strides = [1, 1]} : vector<16x32xf32> to vector<16x8xf32>
    %22 = vector.shape_cast %21 : vector<16x8xf32> to vector<2x8x8xf32>
    %23 = tpu.concatenate %16, %18, %20, %22 in 0 : vector<2x8x8xf32>, vector<2x8x8xf32>, vector<2x8x8xf32>, vector<2x8x8xf32> -> vector<8x8x8xf32>
    %24 = vector.extract_strided_slice %13 {offsets = [0, 0], sizes = [16, 8], strides = [1, 1]} : vector<16x32xf32> to vector<16x8xf32>
    %25 = vector.shape_cast %24 : vector<16x8xf32> to vector<2x8x8xf32>
    %26 = vector.extract_strided_slice %13 {offsets = [0, 8], sizes = [16, 8], strides = [1, 1]} : vector<16x32xf32> to vector<16x8xf32>
    %27 = vector.shape_cast %26 : vector<16x8xf32> to vector<2x8x8xf32>
    %28 = vector.extract_strided_slice %13 {offsets = [0, 16], sizes = [16, 8], strides = [1, 1]} : vector<16x32xf32> to vector<16x8xf32>
    %29 = vector.shape_cast %28 : vector<16x8xf32> to vector<2x8x8xf32>
    %30 = vector.extract_strided_slice %13 {offsets = [0, 24], sizes = [16, 8], strides = [1, 1]} : vector<16x32xf32> to vector<16x8xf32>
    %31 = vector.shape_cast %30 : vector<16x8xf32> to vector<2x8x8xf32>
    %32 = tpu.concatenate %25, %27, %29, %31 in 0 : vector<2x8x8xf32>, vector<2x8x8xf32>, vector<2x8x8xf32>, vector<2x8x8xf32> -> vector<8x8x8xf32>
    %33 = vector.extract_strided_slice %14 {offsets = [0, 0], sizes = [16, 8], strides = [1, 1]} : vector<16x32xf32> to vector<16x8xf32>
    %34 = vector.shape_cast %33 : vector<16x8xf32> to vector<2x8x8xf32>
    %35 = vector.extract_strided_slice %14 {offsets = [0, 8], sizes = [16, 8], strides = [1, 1]} : vector<16x32xf32> to vector<16x8xf32>
    %36 = vector.shape_cast %35 : vector<16x8xf32> to vector<2x8x8xf32>
    %37 = vector.extract_strided_slice %14 {offsets = [0, 16], sizes = [16, 8], strides = [1, 1]} : vector<16x32xf32> to vector<16x8xf32>
    %38 = vector.shape_cast %37 : vector<16x8xf32> to vector<2x8x8xf32>
    %39 = vector.extract_strided_slice %14 {offsets = [0, 24], sizes = [16, 8], strides = [1, 1]} : vector<16x32xf32> to vector<16x8xf32>
    %40 = vector.shape_cast %39 : vector<16x8xf32> to vector<2x8x8xf32>
    %41 = tpu.concatenate %34, %36, %38, %40 in 0 : vector<2x8x8xf32>, vector<2x8x8xf32>, vector<2x8x8xf32>, vector<2x8x8xf32> -> vector<8x8x8xf32>
    %42 = arith.truncf %23 : vector<8x8x8xf32> to vector<8x8x8xbf16>
    %43 = arith.truncf %32 : vector<8x8x8xf32> to vector<8x8x8xbf16>
    "tpu.trace_start"() <{level = 10 : i32, message = "bqd,bkd->bqk"}> : () -> ()
    %cst_16 = arith.constant dense<0.000000e+00> : vector<8x8x8xf32>
    %44 = tpu.matmul %42, %43, %cst_16 {dimension_numbers = #tpu.dot_dimension_numbers<[2], [2], [1], [1], [0, 0, 0, 1, 1, 1], [0], [0]>} : vector<8x8x8xbf16>, vector<8x8x8xbf16>, vector<8x8x8xf32> -> vector<8x8x8xf32>
    %cst_17 = arith.constant 5.000000e-01 : f32
    "tpu.trace_stop"() : () -> ()
    %45 = vector.broadcast %cst_17 : f32 to vector<2x8xf32>
    %46 = arith.cmpf ogt, %4, %45 : vector<2x8xf32>
    %cst_18 = arith.constant 0.000000e+00 : f32
    %cst_19 = arith.constant -1.000000e+30 : f32
    %47 = vector.broadcast %cst_18 : f32 to vector<2x8xf32>
    %48 = vector.broadcast %cst_19 : f32 to vector<2x8xf32>
    %49 = arith.select %46, %47, %48 : vector<2x8xi1>, vector<2x8xf32>
    %50 = vector.shape_cast %49 : vector<2x8xf32> to vector<2x1x8xf32>
    %51 = vector.shape_cast %50 : vector<2x1x8xf32> to vector<2x1x8xf32>
    %52 = vector.broadcast %51 : vector<2x1x8xf32> to vector<2x8x8xf32>
    %53 = tpu.concatenate %52, %52, %52, %52 in 0 : vector<2x8x8xf32>, vector<2x8x8xf32>, vector<2x8x8xf32>, vector<2x8x8xf32> -> vector<8x8x8xf32>
    %54 = arith.addf %44, %53 : vector<8x8x8xf32>
    %cst_20 = arith.constant 0.176776692 : f32
    %55 = vector.broadcast %cst_20 : f32 to vector<8x8x8xf32>
    %56 = arith.mulf %54, %55 : vector<8x8x8xf32>
    %cst_21 = arith.constant dense<0xFF800000> : vector<8x8xf32>
    %57 = vector.multi_reduction <maximumf>, %56, %cst_21 [2] : vector<8x8x8xf32> to vector<8x8xf32>
    %58 = vector.shape_cast %57 : vector<8x8xf32> to vector<8x8x1xf32>
    %59 = vector.broadcast %58 : vector<8x8x1xf32> to vector<8x8x8xf32>
    %60 = arith.subf %56, %59 : vector<8x8x8xf32>
    %61 = math.exp %60 : vector<8x8x8xf32>
    %cst_22 = arith.constant dense<0.000000e+00> : vector<8x8xf32>
    %62 = vector.multi_reduction <add>, %61, %cst_22 [2] : vector<8x8x8xf32> to vector<8x8xf32>
    %63 = vector.shape_cast %62 : vector<8x8xf32> to vector<8x8x1xf32>
    %64 = tpu.reciprocal %63 {approx = true} : vector<8x8x1xf32> -> vector<8x8x1xf32>
    %65 = vector.broadcast %64 : vector<8x8x1xf32> to vector<8x8x8xf32>
    %66 = arith.mulf %61, %65 : vector<8x8x8xf32>
    %67 = arith.truncf %66 : vector<8x8x8xf32> to vector<8x8x8xbf16>
    %68 = arith.truncf %41 : vector<8x8x8xf32> to vector<8x8x8xbf16>
    "tpu.trace_start"() <{level = 10 : i32, message = "bqk,bkd->bqd"}> : () -> ()
    %cst_23 = arith.constant dense<0.000000e+00> : vector<8x8x8xf32>
    %69 = tpu.matmul %67, %68, %cst_23 {dimension_numbers = #tpu.dot_dimension_numbers<[2], [1], [1], [2], [0, 0, 0, 1, 1, 2], [0], [0]>} : vector<8x8x8xbf16>, vector<8x8x8xbf16>, vector<8x8x8xf32> -> vector<8x8x8xf32>
    "tpu.trace_stop"() : () -> ()
    %70 = vector.extract_strided_slice %69 {offsets = [0, 0, 0], sizes = [2, 8, 8], strides = [1, 1, 1]} : vector<8x8x8xf32> to vector<2x8x8xf32>
    %71 = vector.shape_cast %70 : vector<2x8x8xf32> to vector<16x8xf32>
    %72 = vector.extract_strided_slice %69 {offsets = [2, 0, 0], sizes = [2, 8, 8], strides = [1, 1, 1]} : vector<8x8x8xf32> to vector<2x8x8xf32>
    %73 = vector.shape_cast %72 : vector<2x8x8xf32> to vector<16x8xf32>
    %74 = vector.extract_strided_slice %69 {offsets = [4, 0, 0], sizes = [2, 8, 8], strides = [1, 1, 1]} : vector<8x8x8xf32> to vector<2x8x8xf32>
    %75 = vector.shape_cast %74 : vector<2x8x8xf32> to vector<16x8xf32>
    %76 = vector.extract_strided_slice %69 {offsets = [6, 0, 0], sizes = [2, 8, 8], strides = [1, 1, 1]} : vector<8x8x8xf32> to vector<2x8x8xf32>
    %77 = vector.shape_cast %76 : vector<2x8x8xf32> to vector<16x8xf32>
    %78 = tpu.concatenate %71, %73, %75, %77 in 1 : vector<16x8xf32>, vector<16x8xf32>, vector<16x8xf32>, vector<16x8xf32> -> vector<16x32xf32>
    %79 = arith.truncf %78 : vector<16x32xf32> to vector<16x32xbf16>
    %cst_24 = arith.constant dense<0.000000e+00> : vector<16x32xf32>
    %80 = tpu.matmul %79, %7, %cst_24 {dimension_numbers = #tpu.dot_dimension_numbers<[1], [0], [0], [1], [0, 0, 1, 1], [], []>} : vector<16x32xbf16>, vector<32x32xbf16>, vector<16x32xf32> -> vector<16x32xf32>
    %81 = vector.broadcast %8 : vector<1x32xf32> to vector<16x32xf32>
    %82 = arith.addf %80, %81 : vector<16x32xf32>
    %83 = arith.addf %82, %1 : vector<16x32xf32>
    %c0_25 = arith.constant 0 : index
    %c0_26 = arith.constant 0 : index
    %84 = vector.load %arg7[%c0_25, %c0_26] : memref<1x32xf32, #tpu.memory_space<vmem>>, vector<1x32xf32>
    %c0_27 = arith.constant 0 : index
    %c0_28 = arith.constant 0 : index
    %85 = vector.load %arg8[%c0_27, %c0_28] : memref<1x32xf32, #tpu.memory_space<vmem>>, vector<1x32xf32>
    %cst_29 = arith.constant dense<0.000000e+00> : vector<16xf32>
    %86 = vector.multi_reduction <add>, %83, %cst_29 [1] : vector<16x32xf32> to vector<16xf32>
    %87 = vector.shape_cast %86 : vector<16xf32> to vector<16x1xf32>
    %cst_30 = arith.constant 3.200000e+01 : f32
    %88 = vector.broadcast %cst_30 : f32 to vector<16x1xf32>
    %89 = arith.divf %87, %88 : vector<16x1xf32>
    %90 = vector.broadcast %89 : vector<16x1xf32> to vector<16x32xf32>
    %91 = arith.subf %83, %90 : vector<16x32xf32>
    %92 = arith.mulf %91, %91 : vector<16x32xf32>
    %cst_31 = arith.constant dense<0.000000e+00> : vector<16xf32>
    %93 = vector.multi_reduction <add>, %92, %cst_31 [1] : vector<16x32xf32> to vector<16xf32>
    %94 = vector.shape_cast %93 : vector<16xf32> to vector<16x1xf32>
    %cst_32 = arith.constant 3.200000e+01 : f32
    %95 = vector.broadcast %cst_32 : f32 to vector<16x1xf32>
    %96 = arith.divf %94, %95 : vector<16x1xf32>
    %cst_33 = arith.constant 9.99999974E-6 : f32
    %97 = vector.broadcast %cst_33 : f32 to vector<16x1xf32>
    %98 = arith.addf %96, %97 : vector<16x1xf32>
    %99 = math.rsqrt %98 : vector<16x1xf32>
    %100 = vector.broadcast %89 : vector<16x1xf32> to vector<16x32xf32>
    %101 = arith.subf %83, %100 : vector<16x32xf32>
    %102 = vector.broadcast %99 : vector<16x1xf32> to vector<16x32xf32>
    %103 = arith.mulf %101, %102 : vector<16x32xf32>
    %104 = vector.broadcast %84 : vector<1x32xf32> to vector<16x32xf32>
    %105 = arith.mulf %103, %104 : vector<16x32xf32>
    %106 = vector.broadcast %85 : vector<1x32xf32> to vector<16x32xf32>
    %107 = arith.addf %105, %106 : vector<16x32xf32>
    %108 = arith.truncf %107 : vector<16x32xf32> to vector<16x32xbf16>
    %c0_34 = arith.constant 0 : index
    %c0_35 = arith.constant 0 : index
    %109 = vector.load %arg9[%c0_34, %c0_35] : memref<32x128xbf16, #tpu.memory_space<vmem>>, vector<32x128xbf16>
    %cst_36 = arith.constant dense<0.000000e+00> : vector<16x128xf32>
    %110 = tpu.matmul %108, %109, %cst_36 {dimension_numbers = #tpu.dot_dimension_numbers<[1], [0], [0], [1], [0, 0, 1, 1], [], []>} : vector<16x32xbf16>, vector<32x128xbf16>, vector<16x128xf32> -> vector<16x128xf32>
    %c0_37 = arith.constant 0 : index
    %c0_38 = arith.constant 0 : index
    %111 = vector.load %arg10[%c0_37, %c0_38] : memref<1x128xf32, #tpu.memory_space<vmem>>, vector<1x128xf32>
    %112 = vector.broadcast %111 : vector<1x128xf32> to vector<16x128xf32>
    %113 = arith.addf %110, %112 : vector<16x128xf32>
    %cst_39 = arith.constant 0.000000e+00 : f32
    %114 = vector.broadcast %cst_39 : f32 to vector<16x128xf32>
    %115 = arith.maximumf %113, %114 : vector<16x128xf32>
    %116 = arith.truncf %115 : vector<16x128xf32> to vector<16x128xbf16>
    %c0_40 = arith.constant 0 : index
    %c0_41 = arith.constant 0 : index
    %117 = vector.load %arg11[%c0_40, %c0_41] : memref<128x32xbf16, #tpu.memory_space<vmem>>, vector<128x32xbf16>
    %cst_42 = arith.constant dense<0.000000e+00> : vector<16x32xf32>
    %118 = tpu.matmul %116, %117, %cst_42 {dimension_numbers = #tpu.dot_dimension_numbers<[1], [0], [0], [1], [0, 0, 1, 1], [], []>} : vector<16x128xbf16>, vector<128x32xbf16>, vector<16x32xf32> -> vector<16x32xf32>
    %c0_43 = arith.constant 0 : index
    %c0_44 = arith.constant 0 : index
    %119 = vector.load %arg12[%c0_43, %c0_44] : memref<1x32xf32, #tpu.memory_space<vmem>>, vector<1x32xf32>
    %120 = vector.broadcast %119 : vector<1x32xf32> to vector<16x32xf32>
    %121 = arith.addf %118, %120 : vector<16x32xf32>
    %122 = arith.addf %121, %107 : vector<16x32xf32>
    %c0_45 = arith.constant 0 : index
    %c0_46 = arith.constant 0 : index
    %123 = vector.load %arg13[%c0_45, %c0_46] : memref<1x32xf32, #tpu.memory_space<vmem>>, vector<1x32xf32>
    %c0_47 = arith.constant 0 : index
    %c0_48 = arith.constant 0 : index
    %124 = vector.load %arg14[%c0_47, %c0_48] : memref<1x32xf32, #tpu.memory_space<vmem>>, vector<1x32xf32>
    %cst_49 = arith.constant dense<0.000000e+00> : vector<16xf32>
    %125 = vector.multi_reduction <add>, %122, %cst_49 [1] : vector<16x32xf32> to vector<16xf32>
    %126 = vector.shape_cast %125 : vector<16xf32> to vector<16x1xf32>
    %cst_50 = arith.constant 3.200000e+01 : f32
    %127 = vector.broadcast %cst_50 : f32 to vector<16x1xf32>
    %128 = arith.divf %126, %127 : vector<16x1xf32>
    %129 = vector.broadcast %128 : vector<16x1xf32> to vector<16x32xf32>
    %130 = arith.subf %122, %129 : vector<16x32xf32>
    %131 = arith.mulf %130, %130 : vector<16x32xf32>
    %cst_51 = arith.constant dense<0.000000e+00> : vector<16xf32>
    %132 = vector.multi_reduction <add>, %131, %cst_51 [1] : vector<16x32xf32> to vector<16xf32>
    %133 = vector.shape_cast %132 : vector<16xf32> to vector<16x1xf32>
    %cst_52 = arith.constant 3.200000e+01 : f32
    %134 = vector.broadcast %cst_52 : f32 to vector<16x1xf32>
    %135 = arith.divf %133, %134 : vector<16x1xf32>
    %cst_53 = arith.constant 9.99999974E-6 : f32
    %136 = vector.broadcast %cst_53 : f32 to vector<16x1xf32>
    %137 = arith.addf %135, %136 : vector<16x1xf32>
    %138 = math.rsqrt %137 : vector<16x1xf32>
    %139 = vector.broadcast %128 : vector<16x1xf32> to vector<16x32xf32>
    %140 = arith.subf %122, %139 : vector<16x32xf32>
    %141 = vector.broadcast %138 : vector<16x1xf32> to vector<16x32xf32>
    %142 = arith.mulf %140, %141 : vector<16x32xf32>
    %143 = vector.broadcast %123 : vector<1x32xf32> to vector<16x32xf32>
    %144 = arith.mulf %142, %143 : vector<16x32xf32>
    %145 = vector.broadcast %124 : vector<1x32xf32> to vector<16x32xf32>
    %146 = arith.addf %144, %145 : vector<16x32xf32>
    %147 = vector.shape_cast %146 : vector<16x32xf32> to vector<2x8x32xf32>
    %c0_54 = arith.constant 0 : index
    %c0_55 = arith.constant 0 : index
    %c0_56 = arith.constant 0 : index
    %148 = vector.load %arg15[%c0_54, %c0_55, %c0_56] : memref<2x8x32xf32, #tpu.memory_space<vmem>>, vector<2x8x32xf32>
    tpu.vector_store %arg15[%c0_54, %c0_55, %c0_56], %147 {strides = array<i32>} : memref<2x8x32xf32, #tpu.memory_space<vmem>>, vector<2x8x32xf32>,
    return
  }
}

module attributes {stable_mosaic.version = 11 : i64} {
  func.func @linear_kernel(%arg0: memref<16x32xf32, #tpu.memory_space<vmem>>, %arg1: memref<32x41xbf16, #tpu.memory_space<vmem>>, %arg2: memref<1x41xf32, #tpu.memory_space<vmem>>, %arg3: memref<16x41xf32, #tpu.memory_space<vmem>>) attributes {dimension_semantics = [], scalar_prefetch = 0 : i64, scratch_operands = 0 : i64, tpu.core_type = #tpu.core_type<tc>} {
    %c0 = arith.constant 0 : index
    %c0_0 = arith.constant 0 : index
    %0 = vector.load %arg0[%c0, %c0_0] : memref<16x32xf32, #tpu.memory_space<vmem>>, vector<16x32xf32>
    %1 = arith.truncf %0 : vector<16x32xf32> to vector<16x32xbf16>
    %c0_1 = arith.constant 0 : index
    %c0_2 = arith.constant 0 : index
    %2 = vector.load %arg1[%c0_1, %c0_2] : memref<32x41xbf16, #tpu.memory_space<vmem>>, vector<32x41xbf16>
    %cst = arith.constant dense<0.000000e+00> : vector<16x41xf32>
    %3 = tpu.matmul %1, %2, %cst {dimension_numbers = #tpu.dot_dimension_numbers<[1], [0], [0], [1], [0, 0, 1, 1], [], []>} : vector<16x32xbf16>, vector<32x41xbf16>, vector<16x41xf32> -> vector<16x41xf32>
    %c0_3 = arith.constant 0 : index
    %c0_4 = arith.constant 0 : index
    %4 = vector.load %arg2[%c0_3, %c0_4] : memref<1x41xf32, #tpu.memory_space<vmem>>, vector<1x41xf32>
    %5 = vector.broadcast %4 : vector<1x41xf32> to vector<16x41xf32>
    %6 = arith.addf %3, %5 : vector<16x41xf32>
    %c0_5 = arith.constant 0 : index
    %c0_6 = arith.constant 0 : index
    %7 = vector.load %arg3[%c0_5, %c0_6] : memref<16x41xf32, #tpu.memory_space<vmem>>, vector<16x41xf32>
    tpu.vector_store %arg3[%c0_5, %c0_6], %6 {strides = array<i32>} : memref<16x41xf32, #tpu.memory_space<vmem>>, vector<16x41xf32>,
    return
  }
}

module attributes {stable_mosaic.version = 11 : i64} {
  func.func @attn_ln_kernel(%arg0: memref<2x8x32xf32, #tpu.memory_space<vmem>>, %arg1: memref<2x8x32xf32, #tpu.memory_space<vmem>>, %arg2: memref<2x8xf32, #tpu.memory_space<vmem>>, %arg3: memref<32x32xbf16, #tpu.memory_space<vmem>>, %arg4: memref<32x64xbf16, #tpu.memory_space<vmem>>, %arg5: memref<32x32xbf16, #tpu.memory_space<vmem>>, %arg6: memref<1x32xf32, #tpu.memory_space<vmem>>, %arg7: memref<1x32xf32, #tpu.memory_space<vmem>>, %arg8: memref<1x32xf32, #tpu.memory_space<vmem>>, %arg9: memref<2x8x32xf32, #tpu.memory_space<vmem>>) attributes {dimension_semantics = [], scalar_prefetch = 0 : i64, scratch_operands = 0 : i64, tpu.core_type = #tpu.core_type<tc>} {
    %c0 = arith.constant 0 : index
    %c0_0 = arith.constant 0 : index
    %c0_1 = arith.constant 0 : index
    %0 = vector.load %arg0[%c0, %c0_0, %c0_1] : memref<2x8x32xf32, #tpu.memory_space<vmem>>, vector<2x8x32xf32>
    %1 = vector.shape_cast %0 : vector<2x8x32xf32> to vector<16x32xf32>
    %c0_2 = arith.constant 0 : index
    %c0_3 = arith.constant 0 : index
    %c0_4 = arith.constant 0 : index
    %2 = vector.load %arg1[%c0_2, %c0_3, %c0_4] : memref<2x8x32xf32, #tpu.memory_space<vmem>>, vector<2x8x32xf32>
    %3 = vector.shape_cast %2 : vector<2x8x32xf32> to vector<16x32xf32>
    %c0_5 = arith.constant 0 : index
    %c0_6 = arith.constant 0 : index
    %4 = vector.load %arg2[%c0_5, %c0_6] : memref<2x8xf32, #tpu.memory_space<vmem>>, vector<2x8xf32>
    %c0_7 = arith.constant 0 : index
    %c0_8 = arith.constant 0 : index
    %5 = vector.load %arg3[%c0_7, %c0_8] : memref<32x32xbf16, #tpu.memory_space<vmem>>, vector<32x32xbf16>
    %c0_9 = arith.constant 0 : index
    %c0_10 = arith.constant 0 : index
    %6 = vector.load %arg4[%c0_9, %c0_10] : memref<32x64xbf16, #tpu.memory_space<vmem>>, vector<32x64xbf16>
    %c0_11 = arith.constant 0 : index
    %c0_12 = arith.constant 0 : index
    %7 = vector.load %arg5[%c0_11, %c0_12] : memref<32x32xbf16, #tpu.memory_space<vmem>>, vector<32x32xbf16>
    %c0_13 = arith.constant 0 : index
    %c0_14 = arith.constant 0 : index
    %8 = vector.load %arg6[%c0_13, %c0_14] : memref<1x32xf32, #tpu.memory_space<vmem>>, vector<1x32xf32>
    %9 = arith.truncf %1 : vector<16x32xf32> to vector<16x32xbf16>
    %cst = arith.constant dense<0.000000e+00> : vector<16x32xf32>
    %10 = tpu.matmul %9, %5, %cst {dimension_numbers = #tpu.dot_dimension_numbers<[1], [0], [0], [1], [0, 0, 1, 1], [], []>} : vector<16x32xbf16>, vector<32x32xbf16>, vector<16x32xf32> -> vector<16x32xf32>
    %11 = arith.truncf %3 : vector<16x32xf32> to vector<16x32xbf16>
    %cst_15 = arith.constant dense<0.000000e+00> : vector<16x64xf32>
    %12 = tpu.matmul %11, %6, %cst_15 {dimension_numbers = #tpu.dot_dimension_numbers<[1], [0], [0], [1], [0, 0, 1, 1], [], []>} : vector<16x32xbf16>, vector<32x64xbf16>, vector<16x64xf32> -> vector<16x64xf32>
    %13 = vector.extract_strided_slice %12 {offsets = [0, 0], sizes = [16, 32], strides = [1, 1]} : vector<16x64xf32> to vector<16x32xf32>
    %14 = vector.extract_strided_slice %12 {offsets = [0, 32], sizes = [16, 32], strides = [1, 1]} : vector<16x64xf32> to vector<16x32xf32>
    %15 = vector.extract_strided_slice %10 {offsets = [0, 0], sizes = [16, 8], strides = [1, 1]} : vector<16x32xf32> to vector<16x8xf32>
    %16 = vector.shape_cast %15 : vector<16x8xf32> to vector<2x8x8xf32>
    %17 = vector.extract_strided_slice %10 {offsets = [0, 8], sizes = [16, 8], strides = [1, 1]} : vector<16x32xf32> to vector<16x8xf32>
    %18 = vector.shape_cast %17 : vector<16x8xf32> to vector<2x8x8xf32>
    %19 = vector.extract_strided_slice %10 {offsets = [0, 16], sizes = [16, 8], strides = [1, 1]} : vector<16x32xf32> to vector<16x8xf32>
    %20 = vector.shape_cast %19 : vector<16x8xf32> to vector<2x8x8xf32>
    %21 = vector.extract_strided_slice %10 {offsets = [0, 24], sizes = [16, 8], strides = [1, 1]} : vector<16x32xf32> to vector<16x8xf32>
    %22 = vector.shape_cast %21 : vector<16x8xf32> to vector<2x8x8xf32>
    %23 = tpu.concatenate %16, %18, %20, %22 in 0 : vector<2x8x8xf32>, vector<2x8x8xf32>, vector<2x8x8xf32>, vector<2x8x8xf32> -> vector<8x8x8xf32>
    %24 = vector.extract_strided_slice %13 {offsets = [0, 0], sizes = [16, 8], strides = [1, 1]} : vector<16x32xf32> to vector<16x8xf32>
    %25 = vector.shape_cast %24 : vector<16x8xf32> to vector<2x8x8xf32>
    %26 = vector.extract_strided_slice %13 {offsets = [0, 8], sizes = [16, 8], strides = [1, 1]} : vector<16x32xf32> to vector<16x8xf32>
    %27 = vector.shape_cast %26 : vector<16x8xf32> to vector<2x8x8xf32>
    %28 = vector.extract_strided_slice %13 {offsets = [0, 16], sizes = [16, 8], strides = [1, 1]} : vector<16x32xf32> to vector<16x8xf32>
    %29 = vector.shape_cast %28 : vector<16x8xf32> to vector<2x8x8xf32>
    %30 = vector.extract_strided_slice %13 {offsets = [0, 24], sizes = [16, 8], strides = [1, 1]} : vector<16x32xf32> to vector<16x8xf32>
    %31 = vector.shape_cast %30 : vector<16x8xf32> to vector<2x8x8xf32>
    %32 = tpu.concatenate %25, %27, %29, %31 in 0 : vector<2x8x8xf32>, vector<2x8x8xf32>, vector<2x8x8xf32>, vector<2x8x8xf32> -> vector<8x8x8xf32>
    %33 = vector.extract_strided_slice %14 {offsets = [0, 0], sizes = [16, 8], strides = [1, 1]} : vector<16x32xf32> to vector<16x8xf32>
    %34 = vector.shape_cast %33 : vector<16x8xf32> to vector<2x8x8xf32>
    %35 = vector.extract_strided_slice %14 {offsets = [0, 8], sizes = [16, 8], strides = [1, 1]} : vector<16x32xf32> to vector<16x8xf32>
    %36 = vector.shape_cast %35 : vector<16x8xf32> to vector<2x8x8xf32>
    %37 = vector.extract_strided_slice %14 {offsets = [0, 16], sizes = [16, 8], strides = [1, 1]} : vector<16x32xf32> to vector<16x8xf32>
    %38 = vector.shape_cast %37 : vector<16x8xf32> to vector<2x8x8xf32>
    %39 = vector.extract_strided_slice %14 {offsets = [0, 24], sizes = [16, 8], strides = [1, 1]} : vector<16x32xf32> to vector<16x8xf32>
    %40 = vector.shape_cast %39 : vector<16x8xf32> to vector<2x8x8xf32>
    %41 = tpu.concatenate %34, %36, %38, %40 in 0 : vector<2x8x8xf32>, vector<2x8x8xf32>, vector<2x8x8xf32>, vector<2x8x8xf32> -> vector<8x8x8xf32>
    %42 = arith.truncf %23 : vector<8x8x8xf32> to vector<8x8x8xbf16>
    %43 = arith.truncf %32 : vector<8x8x8xf32> to vector<8x8x8xbf16>
    "tpu.trace_start"() <{level = 10 : i32, message = "bqd,bkd->bqk"}> : () -> ()
    %cst_16 = arith.constant dense<0.000000e+00> : vector<8x8x8xf32>
    %44 = tpu.matmul %42, %43, %cst_16 {dimension_numbers = #tpu.dot_dimension_numbers<[2], [2], [1], [1], [0, 0, 0, 1, 1, 1], [0], [0]>} : vector<8x8x8xbf16>, vector<8x8x8xbf16>, vector<8x8x8xf32> -> vector<8x8x8xf32>
    %cst_17 = arith.constant 5.000000e-01 : f32
    "tpu.trace_stop"() : () -> ()
    %45 = vector.broadcast %cst_17 : f32 to vector<2x8xf32>
    %46 = arith.cmpf ogt, %4, %45 : vector<2x8xf32>
    %cst_18 = arith.constant 0.000000e+00 : f32
    %cst_19 = arith.constant -1.000000e+30 : f32
    %47 = vector.broadcast %cst_18 : f32 to vector<2x8xf32>
    %48 = vector.broadcast %cst_19 : f32 to vector<2x8xf32>
    %49 = arith.select %46, %47, %48 : vector<2x8xi1>, vector<2x8xf32>
    %50 = vector.shape_cast %49 : vector<2x8xf32> to vector<2x1x8xf32>
    %51 = vector.shape_cast %50 : vector<2x1x8xf32> to vector<2x1x8xf32>
    %52 = vector.broadcast %51 : vector<2x1x8xf32> to vector<2x8x8xf32>
    %53 = tpu.iota {dimensions = array<i32: 0>} : vector<8x8xi32>
    %54 = tpu.iota {dimensions = array<i32: 1>} : vector<8x8xi32>
    %55 = arith.cmpi sle, %54, %53 : vector<8x8xi32>
    %cst_20 = arith.constant 0.000000e+00 : f32
    %cst_21 = arith.constant -1.000000e+30 : f32
    %56 = vector.broadcast %cst_20 : f32 to vector<8x8xf32>
    %57 = vector.broadcast %cst_21 : f32 to vector<8x8xf32>
    %58 = arith.select %55, %56, %57 : vector<8x8xi1>, vector<8x8xf32>
    %59 = vector.shape_cast %58 : vector<8x8xf32> to vector<1x8x8xf32>
    %60 = vector.broadcast %59 : vector<1x8x8xf32> to vector<2x8x8xf32>
    %61 = arith.addf %52, %60 : vector<2x8x8xf32>
    %62 = tpu.concatenate %61, %61, %61, %61 in 0 : vector<2x8x8xf32>, vector<2x8x8xf32>, vector<2x8x8xf32>, vector<2x8x8xf32> -> vector<8x8x8xf32>
    %63 = arith.addf %44, %62 : vector<8x8x8xf32>
    %cst_22 = arith.constant 0.176776692 : f32
    %64 = vector.broadcast %cst_22 : f32 to vector<8x8x8xf32>
    %65 = arith.mulf %63, %64 : vector<8x8x8xf32>
    %cst_23 = arith.constant dense<0xFF800000> : vector<8x8xf32>
    %66 = vector.multi_reduction <maximumf>, %65, %cst_23 [2] : vector<8x8x8xf32> to vector<8x8xf32>
    %67 = vector.shape_cast %66 : vector<8x8xf32> to vector<8x8x1xf32>
    %68 = vector.broadcast %67 : vector<8x8x1xf32> to vector<8x8x8xf32>
    %69 = arith.subf %65, %68 : vector<8x8x8xf32>
    %70 = math.exp %69 : vector<8x8x8xf32>
    %cst_24 = arith.constant dense<0.000000e+00> : vector<8x8xf32>
    %71 = vector.multi_reduction <add>, %70, %cst_24 [2] : vector<8x8x8xf32> to vector<8x8xf32>
    %72 = vector.shape_cast %71 : vector<8x8xf32> to vector<8x8x1xf32>
    %73 = tpu.reciprocal %72 {approx = true} : vector<8x8x1xf32> -> vector<8x8x1xf32>
    %74 = vector.broadcast %73 : vector<8x8x1xf32> to vector<8x8x8xf32>
    %75 = arith.mulf %70, %74 : vector<8x8x8xf32>
    %76 = arith.truncf %75 : vector<8x8x8xf32> to vector<8x8x8xbf16>
    %77 = arith.truncf %41 : vector<8x8x8xf32> to vector<8x8x8xbf16>
    "tpu.trace_start"() <{level = 10 : i32, message = "bqk,bkd->bqd"}> : () -> ()
    %cst_25 = arith.constant dense<0.000000e+00> : vector<8x8x8xf32>
    %78 = tpu.matmul %76, %77, %cst_25 {dimension_numbers = #tpu.dot_dimension_numbers<[2], [1], [1], [2], [0, 0, 0, 1, 1, 2], [0], [0]>} : vector<8x8x8xbf16>, vector<8x8x8xbf16>, vector<8x8x8xf32> -> vector<8x8x8xf32>
    "tpu.trace_stop"() : () -> ()
    %79 = vector.extract_strided_slice %78 {offsets = [0, 0, 0], sizes = [2, 8, 8], strides = [1, 1, 1]} : vector<8x8x8xf32> to vector<2x8x8xf32>
    %80 = vector.shape_cast %79 : vector<2x8x8xf32> to vector<16x8xf32>
    %81 = vector.extract_strided_slice %78 {offsets = [2, 0, 0], sizes = [2, 8, 8], strides = [1, 1, 1]} : vector<8x8x8xf32> to vector<2x8x8xf32>
    %82 = vector.shape_cast %81 : vector<2x8x8xf32> to vector<16x8xf32>
    %83 = vector.extract_strided_slice %78 {offsets = [4, 0, 0], sizes = [2, 8, 8], strides = [1, 1, 1]} : vector<8x8x8xf32> to vector<2x8x8xf32>
    %84 = vector.shape_cast %83 : vector<2x8x8xf32> to vector<16x8xf32>
    %85 = vector.extract_strided_slice %78 {offsets = [6, 0, 0], sizes = [2, 8, 8], strides = [1, 1, 1]} : vector<8x8x8xf32> to vector<2x8x8xf32>
    %86 = vector.shape_cast %85 : vector<2x8x8xf32> to vector<16x8xf32>
    %87 = tpu.concatenate %80, %82, %84, %86 in 1 : vector<16x8xf32>, vector<16x8xf32>, vector<16x8xf32>, vector<16x8xf32> -> vector<16x32xf32>
    %88 = arith.truncf %87 : vector<16x32xf32> to vector<16x32xbf16>
    %cst_26 = arith.constant dense<0.000000e+00> : vector<16x32xf32>
    %89 = tpu.matmul %88, %7, %cst_26 {dimension_numbers = #tpu.dot_dimension_numbers<[1], [0], [0], [1], [0, 0, 1, 1], [], []>} : vector<16x32xbf16>, vector<32x32xbf16>, vector<16x32xf32> -> vector<16x32xf32>
    %90 = vector.broadcast %8 : vector<1x32xf32> to vector<16x32xf32>
    %91 = arith.addf %89, %90 : vector<16x32xf32>
    %92 = arith.addf %91, %1 : vector<16x32xf32>
    %c0_27 = arith.constant 0 : index
    %c0_28 = arith.constant 0 : index
    %93 = vector.load %arg7[%c0_27, %c0_28] : memref<1x32xf32, #tpu.memory_space<vmem>>, vector<1x32xf32>
    %c0_29 = arith.constant 0 : index
    %c0_30 = arith.constant 0 : index
    %94 = vector.load %arg8[%c0_29, %c0_30] : memref<1x32xf32, #tpu.memory_space<vmem>>, vector<1x32xf32>
    %cst_31 = arith.constant dense<0.000000e+00> : vector<16xf32>
    %95 = vector.multi_reduction <add>, %92, %cst_31 [1] : vector<16x32xf32> to vector<16xf32>
    %96 = vector.shape_cast %95 : vector<16xf32> to vector<16x1xf32>
    %cst_32 = arith.constant 3.200000e+01 : f32
    %97 = vector.broadcast %cst_32 : f32 to vector<16x1xf32>
    %98 = arith.divf %96, %97 : vector<16x1xf32>
    %99 = vector.broadcast %98 : vector<16x1xf32> to vector<16x32xf32>
    %100 = arith.subf %92, %99 : vector<16x32xf32>
    %101 = arith.mulf %100, %100 : vector<16x32xf32>
    %cst_33 = arith.constant dense<0.000000e+00> : vector<16xf32>
    %102 = vector.multi_reduction <add>, %101, %cst_33 [1] : vector<16x32xf32> to vector<16xf32>
    %103 = vector.shape_cast %102 : vector<16xf32> to vector<16x1xf32>
    %cst_34 = arith.constant 3.200000e+01 : f32
    %104 = vector.broadcast %cst_34 : f32 to vector<16x1xf32>
    %105 = arith.divf %103, %104 : vector<16x1xf32>
    %cst_35 = arith.constant 9.99999974E-6 : f32
    %106 = vector.broadcast %cst_35 : f32 to vector<16x1xf32>
    %107 = arith.addf %105, %106 : vector<16x1xf32>
    %108 = math.rsqrt %107 : vector<16x1xf32>
    %109 = vector.broadcast %98 : vector<16x1xf32> to vector<16x32xf32>
    %110 = arith.subf %92, %109 : vector<16x32xf32>
    %111 = vector.broadcast %108 : vector<16x1xf32> to vector<16x32xf32>
    %112 = arith.mulf %110, %111 : vector<16x32xf32>
    %113 = vector.broadcast %93 : vector<1x32xf32> to vector<16x32xf32>
    %114 = arith.mulf %112, %113 : vector<16x32xf32>
    %115 = vector.broadcast %94 : vector<1x32xf32> to vector<16x32xf32>
    %116 = arith.addf %114, %115 : vector<16x32xf32>
    %117 = vector.shape_cast %116 : vector<16x32xf32> to vector<2x8x32xf32>
    %c0_36 = arith.constant 0 : index
    %c0_37 = arith.constant 0 : index
    %c0_38 = arith.constant 0 : index
    %118 = vector.load %arg9[%c0_36, %c0_37, %c0_38] : memref<2x8x32xf32, #tpu.memory_space<vmem>>, vector<2x8x32xf32>
    tpu.vector_store %arg9[%c0_36, %c0_37, %c0_38], %117 {strides = array<i32>} : memref<2x8x32xf32, #tpu.memory_space<vmem>>, vector<2x8x32xf32>,
    return
  }
}

</mosaic_0001>

<bundles_post_ra>
// kernel: transformer_forward.13
= control target key start
LH: loop header
LB: loop body
LE: loop exit
PB: predicated region body
PF: predicated region fallthrough
CT: control target
= control target key end

     0   :  { %v152_v1 = vmov 0.0   ;;  %vm153_vm0 = vmmov 0   ;;  %s204_s0 = inlined_call_operand.vmem [shape: f32[16,32], index: 0, kind: input, shape index: {}]   ;;  %s205_s1 = inlined_call_operand.vmem [shape: bf16[32,41], index: 1, kind: input, shape index: {}]   ;;  %s206_s2 = inlined_call_operand.vmem [shape: f32[1,41], index: 2, kind: input, shape index: {}]   ;;  %s207_s3 = inlined_call_operand.hbm [shape: f32[16,41], index: 3, kind: output, shape index: {}]  }
   0x1   :  { %v126_v0 = vld [vmem:[%s205_s1] sm:$0xff]   ;;  %113 = vmatprep.subr.bf16.mxu0 %v152_v1  ;;  %v127_v2 = vld [vmem:[%s205_s1 + $0x8] sm:$0xff]   ;;  %117 = vmatprep.mubr.msk.bf16.mxu0 %vm153_vm0, %v152_v1 }
   0x2   :  { %114 = vmatpush3.bf16.msra.mxu0 %v126_v0  ;;  %v16_v3 = vld [vmem:[%s204_s0] sm:$0xff]  ;;  %v17_v4 = vld [vmem:[%s204_s0 + $0x8] sm:$0xff] }
   0x3   :  { %115 = vmatprep.subr.bf16.mxu0 %v152_v1 }
   0x4   :  { %8 = vsyncpa [#allocation3], 0  ;;  %v18_v5 = vpack.c.bf16 %v17_v4, %v16_v3  ;;  %vm42_vm1 = vcmask 261120   ;;  %v106_v6 = vld [vmem:[%s206_s2] ss:$0 sm:$0xff]  ;;  %s154_s1 = smov [#allocation2]  }
   0x5   :  { %s95_s22 = sshll.u32 %s154_s1, 4  ;;  %vm87_vm2 = vcmask 334848   ;;  %s96_s22 = int_to_ptr.vmem [resolvable:$true] %s95_s22 }
   0x6   :  { %116 = vmatpush3.bf16.msra.mxu0 %v127_v2  ;;  %s128_s0 = scalar_lea.vmem %s96_s22, 256  ;;  %p133_p1 = scmp.lt.s32.totalorder %s96_s22, %s96_s22 }
   0x7   :  { %p129_p0 = scmp.ne.s32.totalorder %s96_s22, %s128_s0  ;;  %p134_p2 = scmp.lt.s32.totalorder %s128_s0, %s128_s0 }
   0x9   :  { %118 = vmatmul.mubr.msk.bf16.vlgmr.msra.gmra.mrb[0].mxu0 %vm42_vm1, %v18_v5  ;;  %p135_p3 = por %p134_p2, %p133_p1 }
   0xb   :  { %p136_p4 = pnand %p135_p3, %p129_p0 }
  0xdc   :  { %v80_v7 = vpop.f32.mrb[0].mxu0 }
  0xdd   :  { %v81_v8 = vadd.f32 %v106_v6, %v80_v7  ;;  %v119_v9 = vpop.f32.mrb[1].mxu0 }
  0xde   :  { %v83_v10 = vpop.f32.mrb[2].mxu0 }
  0xdf   :  { %88 = vst.msk [vmem:[#allocation2] sm:$0xff] %vm87_vm2, %v81_v8  ;;  %v84_v11 = vadd.f32 %v106_v6, %v83_v10  ;;  %v120_v12 = vpop.f32.mrb[3].mxu0 }
  0xe1   :  { %89 = vst.msk [vmem:[#allocation2 + $0x8] sm:$0xff] %vm87_vm2, %v84_v11 }
  0xe2   :  { %139 = shalt.err (!%p136_p4)
}
  0xe3   :  { %s140_s24 = scalar_lea.hbm %s207_s3, 256 }
  0xe4   :  { %p141_p5 = scmp.ne.s32.totalorder %s207_s3, %s140_s24  ;;  %p144_p6 = scmp.lt.u32.totalorder %s140_s24, %s207_s3 }
  0xe6   :  { %p146_p7 = pnand %p144_p6, %p141_p5 }
  0xe8   :  { %149 = shalt.err (!%p146_p7)
}
  0xe9   :  { %s155_s29 = smov 128   ;;  %s156_s30 = smov 8  }
  0xea   :  { %101 = dma.vmem_to_hbm [thread:$0]  %s96_s22, 256, %s207_s3, [#allocation3], %s155_s29, %s155_s29, %s156_s30  }
  0xeb   :  { %150 = dma.done.wait [#allocation3], 256  }
  0xec   :  { %151 = vsyncadd [#allocation3], 4294967040 }
  0xed   :  { %105 = vsyncpa [#allocation3], 1 }

// kernel: transformer_forward.9
= control target key start
LH: loop header
LB: loop body
LE: loop exit
PB: predicated region body
PF: predicated region fallthrough
CT: control target
= control target key end

     0   :  { %v1566_v0 = vmov 0.0   ;;  %vm1567_vm0 = vmmov 0   ;;  %vm64_vm1 = vcmask 261120   ;;  %vm265_vm2 = vcmask 64512   ;;  %s1571_s24 = smov 96   ;;  %s1575_s10 = smov 16   ;;  %s1878_s4 = inlined_call_operand.vmem [shape: bf16[32,64], index: 4, kind: input, shape index: {}]   ;;  %s1879_s3 = inlined_call_operand.vmem [shape: bf16[32,32], index: 3, kind: input, shape index: {}]   ;;  %s1880_s1 = inlined_call_operand.vmem [shape: f32[2,8,32], index: 1, kind: input, shape index: {}, may-alias: {0,1}]   ;;  %s1881_s0 = inlined_call_operand.vmem [shape: f32[2,8,32], index: 0, kind: input, shape index: {}, may-alias: {0,1}]   ;;  %s1882_s2 = inlined_call_operand.vmem [shape: f32[2,8], index: 2, kind: input, shape index: {}]   ;;  %s1883_s5 = inlined_call_operand.vmem [shape: bf16[32,32], index: 5, kind: input, shape index: {}]   ;;  %s1884_s6 = inlined_call_operand.vmem [shape: f32[1,32], index: 6, kind: input, shape index: {}]   ;;  %s1885_s7 = inlined_call_operand.vmem [shape: f32[1,32], index: 7, kind: input, shape index: {}]   ;;  %s1886_s8 = inlined_call_operand.vmem [shape: f32[1,32], index: 8, kind: input, shape index: {}]   ;;  %s1887_s9 = inlined_call_operand.vmem [shape: f32[2,8,32], index: 9, kind: output, shape index: {}]  }
   0x1   :  { %1356 = vmatprep.subr.bf16.mxu1 %v1566_v0  ;;  %v1524_v1 = vld [vmem:[%s1878_s4] sm:$0xff]   ;;  %1348 = vmatprep.subr.bf16.mxu0 %v1566_v0  ;;  %v1526_v3 = vld [vmem:[%s1878_s4 + $0x8] sm:$0xff]   ;;  %vm744_vm3 = vcmask 1043456   ;;  %s1576_s11 = smov 24   ;;  %vm1157_vm6 = vcmask 130048   ;;  %vm1160_vm7 = vcmask 195584  }
   0x2   :  { %v1525_v2 = vld [vmem:[%s1879_s3] sm:$0xff]   ;;  %1360 = vmatprep.mubr.msk.bf16.mxu1 %vm1567_vm0, %v1566_v0  ;;  %1352 = vmatprep.mubr.msk.bf16.mxu0 %vm1567_vm0, %v1566_v0  ;;  %v36_v5 = vld [vmem:[%s1880_s1 + $0x8] sm:$0xff] }
   0x3   :  { %1357 = vmatpush3.bf16.msra.mxu1 %v1524_v1  ;;  %1349 = vmatpush3.bf16.msra.mxu0 %v1525_v2  ;;  %v35_v4 = vld [vmem:[%s1880_s1] sm:$0xff]  ;;  %v1527_v6 = vld [vmem:[%s1879_s3 + $0x8] sm:$0xff]   ;;  %s1569_s1 = smov 120   ;;  %s1570_s3 = smov 104   ;;  %v1572_v2 = vmov 1966171168  }
   0x4   :  { %1358 = vmatprep.subr.bf16.mxu1 %v1566_v0  ;;  %1350 = vmatprep.subr.bf16.mxu0 %v1566_v0  ;;  %v1656_v7 = vld [vmem:[%s1881_s0] sm:$0xff]  ;;  %v109_v8 = vpack.c.bf16 %v36_v5, %v35_v4  ;;  %v1661_v9 = vld [vmem:[%s1881_s0 + $0x8] sm:$0xff]  ;;  %s1568_s0 = smov 112   ;;  %v228_v4 = vlaneseq }
   0x5   :  { %v51_v10 = vpack.c.bf16 %v1661_v9, %v1656_v7  ;;  %v37_v5 = vld [vmem:[%s1882_s2] sm:$0x3]  ;;  %s1574_s2 = smov 8  }
   0x6   :  { %vm222_vm4 = vcmp.gt.f32.partialorder %v37_v5, 0.5 }
   0x7   :  { %1359 = vmatpush3.bf16.msra.mxu1 %v1526_v3  ;;  %1351 = vmatpush3.bf16.msra.mxu0 %v1527_v6  ;;  %v226_v3 = vunpack.c.l.s4 %v1572_v2 }
   0x8   :  { %1370 = vmatprep.subr.bf16.mxu1 %v1566_v0  ;;  %1364 = vmatprep.subr.bf16.mxu0 %v1566_v0 }
   0x9   :  { %v227_v6 = vunpack.c.0.s8 %v226_v3 }
   0xa   :  { %1361 = vmatmul.mubr.msk.bf16.vlgmr.msra.gmra.mrb[0].mxu1 %vm64_vm1, %v109_v8  ;;  %1353 = vmatmul.mubr.msk.bf16.vlgmr.msra.gmra.mrb[0].mxu0 %vm64_vm1, %v51_v10  ;;  %v229_v8 = vshrl.u32 %v228_v4, 7 }
   0xb   :  { %1372 = vmatprep.mubr.msk.bf16.mxu1 %vm1567_vm0, %v1566_v0  ;;  %1366 = vmatprep.mubr.msk.bf16.mxu0 %vm1567_vm0, %v1566_v0 }
   0xc   :  { %v230_v10 = vsub.s32 %v227_v6, %v229_v8 }
  0xdd   :  { %v159_v11 = vpop.f32.mrb[0].mxu1  ;;  %v102_v13 = vpop.f32.mrb[0].mxu0 }
  0xde   :  { %v1362_v12 = vpop.f32.mrb[1].mxu1  ;;  %v214_v14 = vpack.c.bf16 %v159_v11, %v159_v11  ;;  %v1354_v16 = vpop.f32.mrb[1].mxu0  ;;  %v206_v25 = vpack.c.bf16 %v102_v13, %v102_v13 }
  0xdf   :  { %v162_v15 = vpop.f32.mrb[2].mxu1  ;;  %v105_v20 = vpop.f32.mrb[2].mxu0 }
  0xe0   :  { %v1363_v17 = vpop.f32.mrb[3].mxu1  ;;  %v270_v18 = vsel %vm265_vm2, %v214_v14, 0  ;;  %v1489_v19 = vpack.i.bf16 %v162_v15, %v159_v11  ;;  %v1674_v21 = vpack.c.bf16 %v162_v15, %v162_v15  ;;  %v1494_v22 = vpack.i.bf16 %v105_v20, %v102_v13  ;;  %v1355_v23 = vpop.f32.mrb[3].mxu0 }
  0xe1   :  { %1365 = vmatpush3.bf16.xpose.msra.mxu0 %v270_v18  ;;  %v207_v26 = vpack.c.bf16 %v105_v20, %v105_v20  ;;  %v1573_v11 = vmov -1e+30   ;;  %v249_v17 = vsub.s32 0, %v229_v8 }
  0xe2   :  { %1490 = vrot.lane.b32.xlu1 %v1489_v19, %s1568_s0  ;;  %1480 = vrot.lane.b32.xlu0 %v1489_v19, %s1569_s1  ;;  %v316_v24 = vsel %vm265_vm2, %v1674_v21, 0  ;;  %v223_v12 = vsel %vm222_vm4, 0.0, %v1573_v11 }
  0xe3   :  { %1371 = vmatpush3.bf16.xpose.msra.mxu1 %v316_v24  ;;  %1376 = vmatprep.subr.bf16.mxu0 %v1566_v0  ;;  %v231_v13 = vrot.slane %v223_v12, %v230_v10 }
  0xe4   :  { %1382 = vmatprep.subr.bf16.mxu1 %v1566_v0 }
  0xe5   :  { %v232_v15 = vcombine.high %v231_v13, %v231_v13  ;;  %v239_v16 = vrot.slane %v231_v13, %v230_v10 }
  0xe6   :  { %1495 = vrot.lane.b32.xlu1 %v1494_v22, %s1568_s0  ;;  %1485 = vrot.lane.b32.xlu0 %v1494_v22, %s1569_s1 }
  0xe7   :  { %v246_v18 = vrot.slane %v232_v15, %v230_v10 }
  0xe8   :  { %1367 = vmatmul.mubr.msk.bf16.vlgmr.msra.gmra.mrb[4].mxu0 %vm265_vm2, %v206_v25 }
  0xe9   :  { %1378 = vmatprep.mubr.msk.bf16.mxu0 %vm1567_vm0, %v1566_v0 }
  0xea   :  { %1505 = vrot.lane.b32.xlu1 %v1494_v22, %s1570_s3  ;;  %1500 = vrot.lane.b32.xlu0 %v1489_v19, %s1570_s3  ;;  %v250_v19 = vrot.slane %v239_v16, %v249_v17  ;;  %v254_v22 = vrot.slane %v246_v18, %v249_v17 }
  0xeb   :  { %1373 = vmatmul.mubr.msk.bf16.vlgmr.msra.gmra.mrb[4].mxu1 %vm265_vm2, %v207_v26 }
  0xec   :  { %1384 = vmatprep.mubr.msk.bf16.mxu1 %vm1567_vm0, %v1566_v0 }
  0xee   :  { %739 = vrot.lane.b32.xlu1 %v214_v14, %s1571_s24  ;;  %v260_v14 = vand.u32 127, %v228_v4 }
  0xf0   :  { %vm261_vm5 = vcmp.le.s32.totalorder %v260_v14, %v229_v8 }
  0xf1   :  { %v262_v20 = vsel %vm261_vm5, 0.0, %v1573_v11 }
  0xf2   :  { %v263_v23 = vadd.f32 %v262_v20, %v250_v19  ;;  %v264_v25 = vadd.f32 %v262_v20, %v254_v22 }
 0x154   :  { %v1481_v27 = vpop.permute.xlu0 %1480  ;;  %v1491_v30 = vpop.permute.xlu1 %1490 }
 0x155   :  { %v1483_v28 = vunpack.i.h.bf16 %v1481_v27  ;;  %v1482_v29 = vunpack.i.l.bf16 %v1481_v27  ;;  %v1492_v34 = vunpack.i.l.bf16 %v1491_v30  ;;  %v1493_v37 = vunpack.i.h.bf16 %v1491_v30 }
 0x157   :  { %v1687_v31 = vpack.c.bf16 %v1483_v28, %v1483_v28  ;;  %v1689_v32 = vpack.c.bf16 %v1482_v29, %v1482_v29  ;;  %v1697_v40 = vpack.c.bf16 %v1492_v34, %v1492_v34  ;;  %v1699_v41 = vpack.c.bf16 %v1493_v37, %v1493_v37 }
 0x158   :  { %v1486_v33 = vpop.permute.xlu0 %1485  ;;  %v1496_v47 = vpop.permute.xlu1 %1495 }
 0x159   :  { %v362_v35 = vsel %vm265_vm2, %v1689_v32, 0  ;;  %v408_v36 = vsel %vm265_vm2, %v1687_v31, 0  ;;  %v1487_v38 = vunpack.i.l.bf16 %v1486_v33  ;;  %v1488_v39 = vunpack.i.h.bf16 %v1486_v33 }
 0x15a   :  { %1377 = vmatpush3.bf16.xpose.msra.mxu0 %v362_v35  ;;  %1383 = vmatpush3.bf16.xpose.msra.mxu1 %v408_v36  ;;  %v454_v46 = vsel %vm265_vm2, %v1697_v40, 0  ;;  %v500_v49 = vsel %vm265_vm2, %v1699_v41, 0  ;;  %v1497_v50 = vunpack.i.l.bf16 %v1496_v47  ;;  %v1498_v51 = vunpack.i.h.bf16 %v1496_v47 }
 0x15b   :  { %1388 = vmatprep.subr.bf16.mxu0 %v1566_v0  ;;  %1394 = vmatprep.subr.bf16.mxu1 %v1566_v0  ;;  %v208_v43 = vpack.c.bf16 %v1487_v38, %v1487_v38  ;;  %v209_v44 = vpack.c.bf16 %v1488_v39, %v1488_v39 }
 0x15c   :  { %v1501_v42 = vpop.permute.xlu0 %1500  ;;  %v210_v54 = vpack.c.bf16 %v1497_v50, %v1497_v50  ;;  %v211_v55 = vpack.c.bf16 %v1498_v51, %v1498_v51  ;;  %v1506_v56 = vpop.permute.xlu1 %1505 }
 0x15d   :  { %v1502_v45 = vunpack.i.l.bf16 %v1501_v42  ;;  %v1503_v48 = vunpack.i.h.bf16 %v1501_v42  ;;  %v1507_v59 = vunpack.i.l.bf16 %v1506_v56  ;;  %v1508_v60 = vunpack.i.h.bf16 %v1506_v56 }
 0x15f   :  { %v1712_v52 = vpack.c.bf16 %v1502_v45, %v1502_v45  ;;  %v1715_v53 = vpack.c.bf16 %v1503_v48, %v1503_v48  ;;  %v212_v62 = vpack.c.bf16 %v1507_v59, %v1507_v59  ;;  %v213_v63 = vpack.c.bf16 %v1508_v60, %v1508_v60 }
 0x160   :  { %v740_v61 = vpop.permute.xlu1 %739 }
 0x161   :  { %1379 = vmatmul.mubr.msk.bf16.vlgmr.msra.gmra.mrb[8].mxu0 %vm265_vm2, %v208_v43  ;;  %1385 = vmatmul.mubr.msk.bf16.vlgmr.msra.gmra.mrb[8].mxu1 %vm265_vm2, %v209_v44  ;;  %v546_v57 = vsel %vm265_vm2, %v1712_v52, 0  ;;  %v592_v58 = vsel %vm265_vm2, %v1715_v53, 0  ;;  %v746_v1 = vsel %vm744_vm3, %v740_v61, 0 }
 0x162   :  { %1389 = vmatpush3.bf16.xpose.msra.mxu0 %v454_v46  ;;  %1395 = vmatpush3.bf16.xpose.msra.mxu1 %v500_v49 }
 0x163   :  { %1390 = vmatprep.mubr.msk.bf16.mxu0 %vm1567_vm0, %v1566_v0  ;;  %1396 = vmatprep.mubr.msk.bf16.mxu1 %vm1567_vm0, %v1566_v0 }
 0x164   :  { %1400 = vmatprep.subr.bf16.mxu0 %v1566_v0  ;;  %1406 = vmatprep.subr.bf16.mxu1 %v1566_v0 }
 0x169   :  { %1391 = vmatmul.mubr.msk.bf16.vlgmr.msra.gmra.mrb[12].mxu0 %vm265_vm2, %v210_v54  ;;  %1397 = vmatmul.mubr.msk.bf16.vlgmr.msra.gmra.mrb[12].mxu1 %vm265_vm2, %v211_v55 }
 0x16a   :  { %1401 = vmatpush3.bf16.xpose.msra.mxu0 %v546_v57  ;;  %1407 = vmatpush3.bf16.xpose.msra.mxu1 %v592_v58 }
 0x16b   :  { %1402 = vmatprep.mubr.msk.bf16.mxu0 %vm1567_vm0, %v1566_v0  ;;  %1408 = vmatprep.mubr.msk.bf16.mxu1 %vm1567_vm0, %v1566_v0 }
 0x16c   :  { %1412 = vmatprep.subr.bf16.mxu0 %v1566_v0  ;;  %1418 = vmatprep.subr.bf16.mxu1 %v1566_v0 }
 0x171   :  { %1403 = vmatmul.mubr.msk.bf16.vlgmr.msra.gmra.mrb[16].mxu0 %vm265_vm2, %v212_v62  ;;  %1409 = vmatmul.mubr.msk.bf16.vlgmr.msra.gmra.mrb[16].mxu1 %vm265_vm2, %v213_v63 }
 0x172   :  { %1413 = vmatpush3.bf16.msra.mxu0 %v746_v1  ;;  %1420 = vmatprep.mubr.msk.bf16.mxu1 %vm1567_vm0, %v1566_v0 }
 0x173   :  { %1414 = vmatprep.mubr.msk.bf16.mxu0 %vm1567_vm0, %v1566_v0  ;;  %1424 = vmatprep.subr.bf16.mxu0 %v1566_v0 }
 0x1bb   :  { %v306_v24 = vpop.f32.mrb[4].mxu0 }
 0x1bc   :  { %v307_v26 = vadd.f32 %v306_v24, %v263_v23  ;;  %v1368_v27 = vpop.f32.mrb[5].mxu0 }
 0x1bd   :  { %v309_v28 = vpop.f32.mrb[6].mxu0 }
 0x1be   :  { %v1740_v29 = vmul.f32 0.17677669, %v307_v26  ;;  %v352_v30 = vpop.f32.mrb[4].mxu1  ;;  %v1369_v33 = vpop.f32.mrb[7].mxu0 }
 0x1bf   :  { %v353_v34 = vadd.f32 %v352_v30, %v264_v25  ;;  %v1374_v35 = vpop.f32.mrb[5].mxu1 }
 0x1c0   :  { %v355_v36 = vpop.f32.mrb[6].mxu1  ;;  %v642_v37 = vsel %vm265_vm2, %v1740_v29, -inf }
 0x1c1   :  { %v635_v38 = vmul.f32 0.17677669, %v353_v34  ;;  %v1375_v39 = vpop.f32.mrb[7].mxu1  ;;  %643 = vmax.xlane.f32.xlu0 %v642_v37 }
 0x1c3   :  { %v645_v42 = vsel %vm265_vm2, %v635_v38, -inf }
 0x1c4   :  { %646 = vmax.xlane.f32.xlu1 %v645_v42 }
 0x234   :  { %v398_v43 = vpop.f32.mrb[8].mxu0  ;;  %v444_v45 = vpop.f32.mrb[8].mxu1 }
 0x235   :  { %v399_v44 = vadd.f32 %v398_v43, %v263_v23  ;;  %v1380_v46 = vpop.f32.mrb[9].mxu0  ;;  %v445_v47 = vadd.f32 %v444_v45, %v264_v25  ;;  %v1386_v48 = vpop.f32.mrb[9].mxu1 }
 0x236   :  { %v401_v49 = vpop.f32.mrb[10].mxu0  ;;  %v447_v51 = vpop.f32.mrb[10].mxu1 }
 0x237   :  { %v636_v50 = vmul.f32 0.17677669, %v399_v44  ;;  %v1381_v54 = vpop.f32.mrb[11].mxu0  ;;  %v1387_v55 = vpop.f32.mrb[11].mxu1  ;;  %v637_v56 = vmul.f32 0.17677669, %v445_v47 }
 0x239   :  { %v648_v57 = vsel %vm265_vm2, %v636_v50, -inf  ;;  %v651_v62 = vsel %vm265_vm2, %v637_v56, -inf }
 0x23a   :  { %649 = vmax.xlane.f32.xlu0 %v648_v57 }
 0x23c   :  { %v490_v58 = vpop.f32.mrb[12].mxu0  ;;  %v536_v60 = vpop.f32.mrb[12].mxu1 }
 0x23d   :  { %v491_v59 = vadd.f32 %v490_v58, %v263_v23  ;;  %v1392_v61 = vpop.f32.mrb[13].mxu0  ;;  %v537_v63 = vadd.f32 %v536_v60, %v264_v25  ;;  %v1398_v1 = vpop.f32.mrb[13].mxu1 }
 0x23e   :  { %652 = vmax.xlane.f32.xlu0 %v651_v62  ;;  %v493_v2 = vpop.f32.mrb[14].mxu0  ;;  %v539_v4 = vpop.f32.mrb[14].mxu1 }
 0x23f   :  { %v1747_v3 = vmul.f32 0.17677669, %v491_v59  ;;  %v1393_v5 = vpop.f32.mrb[15].mxu0  ;;  %v1749_v6 = vmul.f32 0.17677669, %v537_v63  ;;  %v1399_v8 = vpop.f32.mrb[15].mxu1 }
 0x241   :  { %v654_v10 = vsel %vm265_vm2, %v1747_v3, -inf  ;;  %v657_v11 = vsel %vm265_vm2, %v1749_v6, -inf }
 0x242   :  { %655 = vmax.xlane.f32.xlu1 %v654_v10  ;;  %658 = vmax.xlane.f32.xlu0 %v657_v11 }
 0x244   :  { %v582_v12 = vpop.f32.mrb[16].mxu0  ;;  %v628_v14 = vpop.f32.mrb[16].mxu1 }
 0x245   :  { %v583_v13 = vadd.f32 %v582_v12, %v263_v23  ;;  %v1404_v15 = vpop.f32.mrb[17].mxu0  ;;  %v629_v16 = vadd.f32 %v628_v14, %v264_v25  ;;  %v1410_v17 = vpop.f32.mrb[17].mxu1 }
 0x246   :  { %v585_v18 = vpop.f32.mrb[18].mxu0  ;;  %v631_v20 = vpop.f32.mrb[18].mxu1 }
 0x247   :  { %v640_v19 = vmul.f32 0.17677669, %v583_v13  ;;  %v1405_v22 = vpop.f32.mrb[19].mxu0  ;;  %v641_v24 = vmul.f32 0.17677669, %v629_v16  ;;  %v1411_v26 = vpop.f32.mrb[19].mxu1 }
 0x249   :  { %v660_v27 = vsel %vm265_vm2, %v640_v19, -inf  ;;  %v663_v28 = vsel %vm265_vm2, %v641_v24, -inf }
 0x24a   :  { %661 = vmax.xlane.f32.xlu1 %v660_v27  ;;  %664 = vmax.xlane.f32.xlu0 %v663_v28 }
 0x24e   :  { %v644_v25 = vpop.xlane.xlu0 %643 }
 0x24f   :  { %v666_v33 = vsub.f32 %v1740_v29, %v644_v25 }
 0x251   :  { %v647_v23 = vpop.xlane.xlu1 %646  ;;  %v674_v35 = vmul.f32 1.442695, %v666_v33 }
 0x252   :  { %v667_v30 = vsub.f32 %v635_v38, %v647_v23 }
 0x254   :  { %v676_v34 = vmul.f32 1.442695, %v667_v30 }
 0x256   :  { %1530 = vpow2.f32 %v676_v34 }
 0x257   :  { %1532 = vpow2.f32 %v674_v35 }
 0x25b   :  { %838 = vrot.lane.b32.xlu1 %v1689_v32, %s1571_s24 }
 0x25f   :  { %887 = vrot.lane.b32.xlu1 %v1687_v31, %s1571_s24 }
 0x260   :  { %789 = vrot.lane.b32.xlu0 %v1674_v21, %s1571_s24  ;;  %v1531_v36 = vpop.eup %1530 }
 0x261   :  { %v1764_v37 = vpop.eup %1532  ;;  %v693_v32 = vsel %vm265_vm2, %v1531_v36, 0.0 }
 0x262   :  { %v690_v31 = vsel %vm265_vm2, %v1764_v37, 0.0 }
 0x27f   :  { %694 = vadd.xlane.f32.xlu0 %v693_v32 }
 0x283   :  { %691 = vadd.xlane.f32.xlu1 %v690_v31 }
 0x2c7   :  { %v650_v21 = vpop.xlane.xlu0 %649 }
 0x2c8   :  { %v668_v39 = vsub.f32 %v636_v50, %v650_v21 }
 0x2ca   :  { %v678_v42 = vmul.f32 1.442695, %v668_v39 }
 0x2cb   :  { %v653_v38 = vpop.xlane.xlu0 %652 }
 0x2cc   :  { %1534 = vpow2.f32 %v678_v42  ;;  %v669_v29 = vsub.f32 %v637_v56, %v653_v38 }
 0x2ce   :  { %v680_v43 = vmul.f32 1.442695, %v669_v29 }
 0x2cf   :  { %v659_v44 = vpop.xlane.xlu0 %658  ;;  %v656_v54 = vpop.xlane.xlu1 %655 }
 0x2d0   :  { %1536 = vpow2.f32 %v680_v43  ;;  %v670_v55 = vsub.f32 %v1747_v3, %v656_v54  ;;  %v671_v57 = vsub.f32 %v1749_v6, %v659_v44 }
 0x2d2   :  { %v682_v58 = vmul.f32 1.442695, %v670_v55  ;;  %v684_v60 = vmul.f32 1.442695, %v671_v57 }
 0x2d4   :  { %1538 = vpow2.f32 %v682_v58 }
 0x2d5   :  { %1540 = vpow2.f32 %v684_v60 }
 0x2d6   :  { %v1769_v45 = vpop.eup %1534 }
 0x2d7   :  { %v696_v46 = vsel %vm265_vm2, %v1769_v45, 0.0  ;;  %v665_v47 = vpop.xlane.xlu0 %664  ;;  %v662_v56 = vpop.xlane.xlu1 %661 }
 0x2d8   :  { %697 = vadd.xlane.f32.xlu1 %v696_v46  ;;  %v672_v59 = vsub.f32 %v640_v19, %v662_v56  ;;  %v673_v61 = vsub.f32 %v641_v24, %v665_v47 }
 0x2da   :  { %v1773_v48 = vpop.eup %1536  ;;  %v686_v62 = vmul.f32 1.442695, %v672_v59  ;;  %v688_v63 = vmul.f32 1.442695, %v673_v61 }
 0x2db   :  { %v699_v49 = vsel %vm265_vm2, %v1773_v48, 0.0  ;;  %v790_v50 = vpop.permute.xlu0 %789  ;;  %v839_v1 = vpop.permute.xlu1 %838 }
 0x2dc   :  { %700 = vadd.xlane.f32.xlu0 %v699_v49  ;;  %v795_v51 = vsel %vm744_vm3, %v790_v50, 0  ;;  %1542 = vpow2.f32 %v686_v62  ;;  %v844_v20 = vsel %vm744_vm3, %v839_v1, 0 }
 0x2dd   :  { %1419 = vmatpush3.bf16.msra.mxu1 %v795_v51  ;;  %1544 = vpow2.f32 %v688_v63 }
 0x2de   :  { %1430 = vmatprep.subr.bf16.mxu1 %v1566_v0 }
 0x2df   :  { %v888_v2 = vpop.permute.xlu1 %887 }
 0x2e0   :  { %v893_v18 = vsel %vm744_vm3, %v888_v2, 0 }
 0x2e9   :  { %985 = vrot.lane.b32.xlu1 %v1699_v41, %s1571_s24  ;;  %v1785_v41 = vpop.eup %1538 }
 0x2ea   :  { %v702_v3 = vsel %vm265_vm2, %v1785_v41, 0.0 }
 0x2f2   :  { %936 = vrot.lane.b32.xlu0 %v1697_v40, %s1571_s24  ;;  %v1787_v40 = vpop.eup %1540 }
 0x2f3   :  { %v1791_v4 = vpop.eup %1542  ;;  %v705_v8 = vsel %vm265_vm2, %v1787_v40, 0.0 }
 0x2f4   :  { %v708_v10 = vsel %vm265_vm2, %v1791_v4, 0.0  ;;  %v1797_v11 = vpop.eup %1544 }
 0x2f5   :  { %v711_v12 = vsel %vm265_vm2, %v1797_v11, 0.0 }
 0x30c   :  { %v695_v5 = vpop.xlane.xlu0 %694 }
 0x30d   :  { %703 = vadd.xlane.f32.xlu1 %v702_v3  ;;  %1546 = vrcp.f32 %v695_v5 }
 0x310   :  { %v692_v6 = vpop.xlane.xlu1 %691 }
 0x311   :  { %1548 = vrcp.f32 %v692_v6  ;;  %706 = vadd.xlane.f32.xlu0 %v705_v8  ;;  %709 = vadd.xlane.f32.xlu1 %v708_v10  ;;  %v1528_v8 = vld [vmem:[%s1883_s5] sm:$0xff]  }
 0x315   :  { %712 = vadd.xlane.f32.xlu0 %v711_v12 }
 0x317   :  { %v1547_v13 = vpop.eup %1546 }
 0x318   :  { %v723_v14 = vmul.f32 %v1547_v13, %v1531_v36 }
 0x31a   :  { %v731_v16 = vpack.c.bf16 %v723_v14, %v723_v14 }
 0x31b   :  { %v1549_v15 = vpop.eup %1548 }
 0x31c   :  { %v722_v17 = vmul.f32 %v1549_v15, %v1764_v37  ;;  %1421 = vmatmul.mubr.msk.bf16.vlgmr.msra.gmra.mrb[20].mxu1 %vm265_vm2, %v731_v16  ;;  %v1529_v15 = vld [vmem:[%s1883_s5 + $0x8] sm:$0xff]  }
 0x31d   :  { %1431 = vmatpush3.bf16.msra.mxu1 %v893_v18  ;;  %1432 = vmatprep.mubr.msk.bf16.mxu1 %vm1567_vm0, %v1566_v0 }
 0x31e   :  { %v730_v19 = vpack.c.bf16 %v722_v17, %v722_v17  ;;  %1442 = vmatprep.subr.bf16.mxu1 %v1566_v0 }
 0x320   :  { %1415 = vmatmul.mubr.msk.bf16.vlgmr.msra.gmra.mrb[20].mxu0 %vm265_vm2, %v730_v19 }
 0x321   :  { %1425 = vmatpush3.bf16.msra.mxu0 %v844_v20  ;;  %1426 = vmatprep.mubr.msk.bf16.mxu0 %vm1567_vm0, %v1566_v0 }
 0x322   :  { %1083 = vrot.lane.b32.xlu1 %v1715_v53, %s1571_s24  ;;  %1436 = vmatprep.subr.bf16.mxu0 %v1566_v0 }
 0x32b   :  { %1034 = vrot.lane.b32.xlu0 %v1712_v52, %s1571_s24 }
 0x365   :  { %v698_v22 = vpop.xlane.xlu1 %697 }
 0x366   :  { %1550 = vrcp.f32 %v698_v22 }
 0x369   :  { %v701_v24 = vpop.xlane.xlu0 %700  ;;  %v986_v53 = vpop.permute.xlu1 %985 }
 0x36a   :  { %1552 = vrcp.f32 %v701_v24  ;;  %v991_v34 = vsel %vm744_vm3, %v986_v53, 0 }
 0x36d   :  { %v937_v28 = vpop.permute.xlu0 %936 }
 0x36e   :  { %v942_v33 = vsel %vm744_vm3, %v937_v28, 0 }
 0x370   :  { %v1551_v26 = vpop.eup %1550 }
 0x371   :  { %v724_v27 = vmul.f32 %v1551_v26, %v1769_v45 }
 0x373   :  { %v732_v23 = vpack.c.bf16 %v724_v27, %v724_v27 }
 0x374   :  { %v1553_v25 = vpop.eup %1552 }
 0x375   :  { %v725_v30 = vmul.f32 %v1553_v25, %v1773_v48  ;;  %1427 = vmatmul.mubr.msk.bf16.vlgmr.msra.gmra.mrb[24].mxu0 %vm265_vm2, %v732_v23 }
 0x376   :  { %1437 = vmatpush3.bf16.msra.mxu0 %v942_v33  ;;  %1438 = vmatprep.mubr.msk.bf16.mxu0 %vm1567_vm0, %v1566_v0 }
 0x377   :  { %v733_v52 = vpack.c.bf16 %v725_v30, %v725_v30  ;;  %1448 = vmatprep.subr.bf16.mxu0 %v1566_v0 }
 0x379   :  { %1433 = vmatmul.mubr.msk.bf16.vlgmr.msra.gmra.mrb[24].mxu1 %vm265_vm2, %v733_v52 }
 0x37a   :  { %1443 = vmatpush3.bf16.msra.mxu1 %v991_v34  ;;  %1444 = vmatprep.mubr.msk.bf16.mxu1 %vm1567_vm0, %v1566_v0 }
 0x37b   :  { %1454 = vmatprep.subr.bf16.mxu1 %v1566_v0 }
 0x39a   :  { %v704_v35 = vpop.xlane.xlu1 %703 }
 0x39b   :  { %1554 = vrcp.f32 %v704_v35 }
 0x39e   :  { %v707_v36 = vpop.xlane.xlu0 %706  ;;  %v710_v37 = vpop.xlane.xlu1 %709 }
 0x39f   :  { %1556 = vrcp.f32 %v707_v36 }
 0x3a0   :  { %1558 = vrcp.f32 %v710_v37 }
 0x3a2   :  { %v713_v32 = vpop.xlane.xlu0 %712  ;;  %v1084_v45 = vpop.permute.xlu1 %1083 }
 0x3a3   :  { %1560 = vrcp.f32 %v713_v32  ;;  %v1089_v49 = vsel %vm744_vm3, %v1084_v45, 0 }
 0x3a5   :  { %v1555_v31 = vpop.eup %1554 }
 0x3a6   :  { %v726_v21 = vmul.f32 %v1555_v31, %v1785_v41  ;;  %v1035_v39 = vpop.permute.xlu0 %1034 }
 0x3a7   :  { %v1040_v44 = vsel %vm744_vm3, %v1035_v39, 0 }
 0x3a8   :  { %v734_v42 = vpack.c.bf16 %v726_v21, %v726_v21 }
 0x3a9   :  { %v1557_v38 = vpop.eup %1556 }
 0x3aa   :  { %v1559_v29 = vpop.eup %1558  ;;  %v727_v43 = vmul.f32 %v1557_v38, %v1787_v40  ;;  %1439 = vmatmul.mubr.msk.bf16.vlgmr.msra.gmra.mrb[28].mxu0 %vm265_vm2, %v734_v42 }
 0x3ab   :  { %1449 = vmatpush3.bf16.msra.mxu0 %v1040_v44  ;;  %1450 = vmatprep.mubr.msk.bf16.mxu0 %vm1567_vm0, %v1566_v0  ;;  %v728_v46 = vmul.f32 %v1559_v29, %v1791_v4  ;;  %v1301_v44 = vld [vmem:[%s1884_s6] ss:$0 sm:$0xff] }
 0x3ac   :  { %v735_v47 = vpack.c.bf16 %v727_v43, %v727_v43  ;;  %1460 = vmatprep.subr.bf16.mxu0 %v1566_v0 }
 0x3ad   :  { %v1561_v48 = vpop.eup %1560  ;;  %v736_v51 = vpack.c.bf16 %v728_v46, %v728_v46 }
 0x3ae   :  { %1445 = vmatmul.mubr.msk.bf16.vlgmr.msra.gmra.mrb[28].mxu1 %vm265_vm2, %v735_v47  ;;  %v729_v50 = vmul.f32 %v1561_v48, %v1797_v11 }
 0x3af   :  { %1455 = vmatpush3.bf16.msra.mxu1 %v1089_v49  ;;  %1456 = vmatprep.mubr.msk.bf16.mxu1 %vm1567_vm0, %v1566_v0 }
 0x3b0   :  { %v737_v54 = vpack.c.bf16 %v729_v50, %v729_v50 }
 0x3b2   :  { %1451 = vmatmul.mubr.msk.bf16.vlgmr.msra.gmra.mrb[32].mxu0 %vm265_vm2, %v736_v51 }
 0x3b3   :  { %1464 = vmatprep.mubr.msk.bf16.mxu0 %vm1567_vm0, %v1566_v0  ;;  %1461 = vmatpush3.bf16.msra.mxu0 %v1528_v8  ;;  %v1305_v8 = vld [vmem:[%s1885_s7] ss:$0 sm:$0xff] }
 0x3b4   :  { %1462 = vmatprep.subr.bf16.mxu0 %v1566_v0 }
 0x3b6   :  { %1457 = vmatmul.mubr.msk.bf16.vlgmr.msra.gmra.mrb[32].mxu1 %vm265_vm2, %v737_v54 }
 0x3b7   :  { %1463 = vmatpush3.bf16.msra.mxu0 %v1529_v15 }
 0x3ef   :  { %v831_v55 = vpop.f32.mrb[20].mxu1 }
 0x3f0   :  { %v1422_v56 = vpop.f32.mrb[21].mxu1 }
 0x3f1   :  { %v834_v57 = vpop.f32.mrb[22].mxu1 }
 0x3f2   :  { %v1423_v58 = vpop.f32.mrb[23].mxu1 }
 0x3f3   :  { %v782_v59 = vpop.f32.mrb[20].mxu0 }
 0x3f4   :  { %v1416_v60 = vpop.f32.mrb[21].mxu0 }
 0x3f5   :  { %v785_v61 = vpop.f32.mrb[22].mxu0 }
 0x3f6   :  { %v1417_v62 = vpop.f32.mrb[23].mxu0 }
 0x448   :  { %v880_v63 = vpop.f32.mrb[24].mxu0 }
 0x449   :  { %v1428_v1 = vpop.f32.mrb[25].mxu0 }
 0x44a   :  { %v883_v41 = vpop.f32.mrb[26].mxu0 }
 0x44b   :  { %v1429_v40 = vpop.f32.mrb[27].mxu0 }
 0x44c   :  { %v929_v2 = vpop.f32.mrb[24].mxu1 }
 0x44d   :  { %v1509_v3 = vpack.i.bf16 %v929_v2, %v880_v63  ;;  %v1434_v4 = vpop.f32.mrb[25].mxu1 }
 0x44e   :  { %v932_v5 = vpop.f32.mrb[26].mxu1 }
 0x44f   :  { %v1435_v6 = vpop.f32.mrb[27].mxu1  ;;  %1510 = vrot.lane.b32.xlu0 %v1509_v3, %s1574_s2 }
 0x47d   :  { %v978_v10 = vpop.f32.mrb[28].mxu0 }
 0x47e   :  { %v1440_v11 = vpop.f32.mrb[29].mxu0 }
 0x47f   :  { %v981_v12 = vpop.f32.mrb[30].mxu0 }
 0x480   :  { %v1441_v13 = vpop.f32.mrb[31].mxu0  ;;  %v1306_v12 = vld [vmem:[%s1886_s8] ss:$0 sm:$0xff] }
 0x481   :  { %v1027_v14 = vpop.f32.mrb[28].mxu1 }
 0x482   :  { %v1514_v16 = vpack.i.bf16 %v1027_v14, %v978_v10  ;;  %v1446_v17 = vpop.f32.mrb[29].mxu1 }
 0x483   :  { %v1030_v18 = vpop.f32.mrb[30].mxu1 }
 0x484   :  { %v1447_v19 = vpop.f32.mrb[31].mxu1  ;;  %1515 = vrot.lane.b32.xlu1 %v1514_v16, %s1575_s10 }
 0x485   :  { %v1076_v20 = vpop.f32.mrb[32].mxu0 }
 0x486   :  { %v1452_v22 = vpop.f32.mrb[33].mxu0 }
 0x487   :  { %v1079_v24 = vpop.f32.mrb[34].mxu0 }
 0x488   :  { %v1453_v26 = vpop.f32.mrb[35].mxu0 }
 0x489   :  { %v1125_v0 = vpop.f32.mrb[32].mxu1 }
 0x48a   :  { %v1519_v27 = vpack.i.bf16 %v1125_v0, %v1076_v20  ;;  %v1458_v28 = vpop.f32.mrb[33].mxu1 }
 0x48b   :  { %v1128_v23 = vpop.f32.mrb[34].mxu1 }
 0x48c   :  { %v1459_v25 = vpop.f32.mrb[35].mxu1  ;;  %1520 = vrot.lane.b32.xlu0 %v1519_v27, %s1576_s11 }
 0x4c1   :  { %v1511_v30 = vpop.permute.xlu0 %1510 }
 0x4c2   :  { %v1513_v53 = vunpack.i.h.bf16 %v1511_v30  ;;  %v1512_v52 = vunpack.i.l.bf16 %v1511_v30 }
 0x4c4   :  { %v1156_v37 = vsel %vm265_vm2, %v831_v55, %v1513_v53  ;;  %v1155_v32 = vsel %vm265_vm2, %v782_v59, %v1512_v52 }
 0x4f6   :  { %v1516_v33 = vpop.permute.xlu1 %1515 }
 0x4f7   :  { %v1518_v34 = vunpack.i.h.bf16 %v1516_v33  ;;  %v1517_v35 = vunpack.i.l.bf16 %v1516_v33 }
 0x4f9   :  { %v1159_v39 = vsel %vm1157_vm6, %v1156_v37, %v1518_v34  ;;  %v1158_v42 = vsel %vm1157_vm6, %v1155_v32, %v1517_v35 }
 0x4fe   :  { %v1521_v36 = vpop.permute.xlu0 %1520 }
 0x4ff   :  { %v1523_v31 = vunpack.i.h.bf16 %v1521_v36  ;;  %v1522_v21 = vunpack.i.l.bf16 %v1521_v36 }
 0x501   :  { %v1162_v38 = vsel %vm1160_vm7, %v1159_v39, %v1523_v31  ;;  %v1161_v29 = vsel %vm1160_vm7, %v1158_v42, %v1522_v21 }
 0x502   :  { %v1163_v43 = vpack.c.bf16 %v1162_v38, %v1161_v29 }
 0x504   :  { %1465 = vmatmul.mubr.msk.bf16.vlgmr.msra.gmra.mrb[36].mxu0 %vm64_vm1, %v1163_v43 }
 0x5d7   :  { %v1219_v45 = vpop.f32.mrb[36].mxu0 }
 0x5d8   :  { %v1220_v46 = vadd.f32 %v1301_v44, %v1219_v45  ;;  %v1466_v47 = vpop.f32.mrb[37].mxu0 }
 0x5d9   :  { %v1222_v48 = vpop.f32.mrb[38].mxu0 }
 0x5da   :  { %v1223_v49 = vadd.f32 %v1301_v44, %v1222_v48  ;;  %v1467_v50 = vpop.f32.mrb[39].mxu0  ;;  %v1226_v51 = vadd.f32 %v1220_v46, %v1656_v7 }
 0x5dc   :  { %v1230_v54 = vsel %vm64_vm1, %v1226_v51, 0.0  ;;  %v1227_v55 = vadd.f32 %v1223_v49, %v1661_v9 }
 0x5dd   :  { %1231 = vadd.xlane.f32.xlu1 %v1230_v54 }
 0x5de   :  { %v1233_v56 = vsel %vm64_vm1, %v1227_v55, 0.0 }
 0x5df   :  { %1234 = vadd.xlane.f32.xlu0 %v1233_v56 }
 0x66a   :  { %v1232_v57 = vpop.xlane.xlu1 %1231 }
 0x66b   :  { %v1237_v58 = vmul.f32 0.03125, %v1232_v57 }
 0x66c   :  { %v1235_v59 = vpop.xlane.xlu0 %1234 }
 0x66d   :  { %v1239_v60 = vsub.f32 %v1226_v51, %v1237_v58  ;;  %v1238_v61 = vmul.f32 0.03125, %v1235_v59 }
 0x66f   :  { %v1240_v62 = vsub.f32 %v1227_v55, %v1238_v61  ;;  %v1241_v63 = vmul.f32 %v1239_v60, %v1239_v60 }
 0x671   :  { %v1243_v1 = vsel %vm64_vm1, %v1241_v63, 0.0  ;;  %v1242_v41 = vmul.f32 %v1240_v62, %v1240_v62 }
 0x672   :  { %1244 = vadd.xlane.f32.xlu0 %v1243_v1 }
 0x673   :  { %v1246_v7 = vsel %vm64_vm1, %v1242_v41, 0.0 }
 0x674   :  { %1247 = vadd.xlane.f32.xlu1 %v1246_v7 }
 0x6ff   :  { %v1245_v40 = vpop.xlane.xlu0 %1244 }
 0x700   :  { %v1249_v9 = vmul.f32 0.03125, %v1245_v40 }
 0x701   :  { %v1248_v2 = vpop.xlane.xlu1 %1247 }
 0x702   :  { %v1251_v3 = vadd.f32 1e-05, %v1249_v9  ;;  %v1250_v4 = vmul.f32 0.03125, %v1248_v2 }
 0x704   :  { %1562 = vrsqrt.f32 %v1251_v3  ;;  %v1252_v5 = vadd.f32 1e-05, %v1250_v4 }
 0x706   :  { %1564 = vrsqrt.f32 %v1252_v5 }
 0x70e   :  { %v1563_v6 = vpop.eup %1562 }
 0x70f   :  { %v1255_v10 = vmul.f32 %v1563_v6, %v1239_v60 }
 0x710   :  { %v1565_v11 = vpop.eup %1564 }
 0x711   :  { %v1263_v13 = vmul.f32 %v1305_v8, %v1255_v10  ;;  %v1256_v14 = vmul.f32 %v1565_v11, %v1240_v62 }
 0x713   :  { %v1271_v15 = vadd.f32 %v1306_v12, %v1263_v13  ;;  %v1264_v16 = vmul.f32 %v1305_v8, %v1256_v14 }
 0x715   :  { %1273 = vst.msk [vmem:[%s1887_s9] sm:$0xff] %vm64_vm1, %v1271_v15  ;;  %v1272_v17 = vadd.f32 %v1306_v12, %v1264_v16 }
 0x717   :  { %1274 = vst.msk [vmem:[%s1887_s9 + $0x8] sm:$0xff] %vm64_vm1, %v1272_v17 }

// kernel: transformer_forward.7
= control target key start
LH: loop header
LB: loop body
LE: loop exit
PB: predicated region body
PF: predicated region fallthrough
CT: control target
= control target key end

     0   :  { %v1874_v0 = vmov 0.0   ;;  %vm1875_vm0 = vmmov 0   ;;  %vm82_vm1 = vcmask 261120   ;;  %vm275_vm2 = vcmask 64512   ;;  %s1878_s17 = smov 104   ;;  %s1879_s18 = smov 96   ;;  %s2277_s3 = inlined_call_operand.vmem [shape: bf16[32,32], index: 3, kind: input, shape index: {}]   ;;  %s2278_s0 = inlined_call_operand.vmem [shape: f32[2,8,32], index: 0, kind: input, shape index: {}, may-alias: {0,1}]   ;;  %s2279_s4 = inlined_call_operand.vmem [shape: bf16[32,64], index: 4, kind: input, shape index: {}]   ;;  %s2280_s1 = inlined_call_operand.vmem [shape: f32[2,8,32], index: 1, kind: input, shape index: {}, may-alias: {0,1}]   ;;  %s2281_s2 = inlined_call_operand.vmem [shape: f32[2,8], index: 2, kind: input, shape index: {}]   ;;  %s2282_s5 = inlined_call_operand.vmem [shape: bf16[32,32], index: 5, kind: input, shape index: {}]   ;;  %s2283_s6 = inlined_call_operand.vmem [shape: f32[1,32], index: 6, kind: input, shape index: {}]   ;;  %s2284_s9 = inlined_call_operand.vmem [shape: bf16[32,128], index: 9, kind: input, shape index: {}]   ;;  %s2285_s11 = inlined_call_operand.vmem [shape: bf16[128,32], index: 11, kind: input, shape index: {}]   ;;  %s2286_s7 = inlined_call_operand.vmem [shape: f32[1,32], index: 7, kind: input, shape index: {}]   ;;  %s2287_s8 = inlined_call_operand.vmem [shape: f32[1,32], index: 8, kind: input, shape index: {}]   ;;  %s2288_s10 = inlined_call_operand.vmem [shape: f32[1,128], index: 10, kind: input, shape index: {}]   ;;  %s2289_s12 = inlined_call_operand.vmem [shape: f32[1,32], index: 12, kind: input, shape index: {}]   ;;  %s2290_s13 = inlined_call_operand.vmem [shape: f32[1,32], index: 13, kind: input, shape index: {}]   ;;  %s2291_s14 = inlined_call_operand.vmem [shape: f32[1,32], index: 14, kind: input, shape index: {}]   ;;  %s2292_s15 = inlined_call_operand.vmem [shape: f32[2,8,32], index: 15, kind: output, shape index: {}]  }
   0x1   :  { %1614 = vmatprep.subr.bf16.mxu1 %v1874_v0  ;;  %v1818_v1 = vld [vmem:[%s2277_s3] sm:$0xff]   ;;  %1618 = vmatprep.mubr.msk.bf16.mxu1 %vm1875_vm0, %v1874_v0  ;;  %v1819_v2 = vld [vmem:[%s2277_s3 + $0x8] sm:$0xff]   ;;  %vm754_vm3 = vcmask 1043456   ;;  %s1883_s25 = smov 16   ;;  %s1884_s3 = smov 24   ;;  %vm1167_vm5 = vcmask 130048  }
   0x2   :  { %1642 = vmatprep.subr.bf16.mxu0 %v1874_v0  ;;  %1644 = vmatprep.mubr.msk.bf16.mxu0 %vm1875_vm0, %v1874_v0  ;;  %v1980_v3 = vld [vmem:[%s2278_s0] sm:$0xff]  ;;  %v1985_v4 = vld [vmem:[%s2278_s0 + $0x8] sm:$0xff]  ;;  %vm1170_vm6 = vcmask 195584  }
   0x3   :  { %1615 = vmatpush3.bf16.msra.mxu1 %v1818_v1  ;;  %v69_v5 = vpack.c.bf16 %v1985_v4, %v1980_v3  ;;  %v1820_v6 = vld [vmem:[%s2279_s4] sm:$0xff]   ;;  %v1821_v7 = vld [vmem:[%s2279_s4 + $0x8] sm:$0xff]   ;;  %s1877_s4 = smov 120  }
   0x4   :  { %1616 = vmatprep.subr.bf16.mxu1 %v1874_v0  ;;  %v53_v8 = vld [vmem:[%s2280_s1] sm:$0xff]  ;;  %v54_v9 = vld [vmem:[%s2280_s1 + $0x8] sm:$0xff]  ;;  %s1876_s1 = smov 112  }
   0x5   :  { %v127_v10 = vpack.c.bf16 %v54_v9, %v53_v8 }
   0x7   :  { %1617 = vmatpush3.bf16.msra.mxu1 %v1819_v2  ;;  %v1880_v2 = vmov 1966171168  }
   0x8   :  { %1622 = vmatprep.subr.bf16.mxu1 %v1874_v0 }
   0xa   :  { %1619 = vmatmul.mubr.msk.bf16.vlgmr.msra.gmra.mrb[0].mxu1 %vm82_vm1, %v69_v5  ;;  %v244_v5 = vunpack.c.l.s4 %v1880_v2 }
   0xb   :  { %1623 = vmatpush3.bf16.msra.mxu1 %v1820_v6  ;;  %1626 = vmatprep.mubr.msk.bf16.mxu1 %vm1875_vm0, %v1874_v0  ;;  %v246_v6 = vlaneseq }
   0xc   :  { %1624 = vmatprep.subr.bf16.mxu1 %v1874_v0  ;;  %v245_v8 = vunpack.c.0.s8 %v244_v5 }
   0xd   :  { %v247_v9 = vshrl.u32 %v246_v6, 7 }
   0xf   :  { %1625 = vmatpush3.bf16.msra.mxu1 %v1821_v7  ;;  %v55_v7 = vld [vmem:[%s2281_s2] sm:$0x3]  ;;  %s1882_s2 = smov 8  }
  0x10   :  { %1630 = vmatprep.subr.bf16.mxu1 %v1874_v0  ;;  %vm240_vm4 = vcmp.gt.f32.partialorder %v55_v7, 0.5 }
  0x12   :  { %1627 = vmatmul.mubr.msk.bf16.vlgmr.msra.gmra.mrb[4].mxu1 %vm82_vm1, %v127_v10  ;;  %v248_v10 = vsub.s32 %v245_v8, %v247_v9 }
  0x13   :  { %1632 = vmatprep.mubr.msk.bf16.mxu1 %vm1875_vm0, %v1874_v0 }
  0xdd   :  { %v120_v11 = vpop.f32.mrb[0].mxu1 }
  0xde   :  { %v1620_v12 = vpop.f32.mrb[1].mxu1  ;;  %v224_v24 = vpack.c.bf16 %v120_v11, %v120_v11 }
  0xdf   :  { %v123_v13 = vpop.f32.mrb[2].mxu1 }
  0xe0   :  { %v1621_v14 = vpop.f32.mrb[3].mxu1  ;;  %v1788_v15 = vpack.i.bf16 %v123_v13, %v120_v11  ;;  %v225_v26 = vpack.c.bf16 %v123_v13, %v123_v13  ;;  %v1881_v11 = vmov -1e+30  }
  0xe1   :  { %v241_v12 = vsel %vm240_vm4, 0.0, %v1881_v11 }
  0xe2   :  { %v249_v13 = vrot.slane %v241_v12, %v248_v10 }
  0xe4   :  { %v257_v14 = vrot.slane %v249_v13, %v248_v10 }
  0xe5   :  { %v177_v16 = vpop.f32.mrb[4].mxu1 }
  0xe6   :  { %v1628_v17 = vpop.f32.mrb[5].mxu1  ;;  %v232_v18 = vpack.c.bf16 %v177_v16, %v177_v16 }
  0xe7   :  { %v180_v19 = vpop.f32.mrb[6].mxu1  ;;  %v250_v17 = vcombine.high %v249_v13, %v249_v13 }
  0xe8   :  { %v1629_v20 = vpop.f32.mrb[7].mxu1  ;;  %v280_v21 = vsel %vm275_vm2, %v232_v18, 0  ;;  %v1783_v22 = vpack.i.bf16 %v180_v19, %v177_v16  ;;  %v2013_v23 = vpack.c.bf16 %v180_v19, %v180_v19 }
  0xe9   :  { %1631 = vmatpush3.bf16.xpose.msra.mxu1 %v280_v21  ;;  %v264_v21 = vrot.slane %v250_v17, %v248_v10 }
  0xea   :  { %1784 = vrot.lane.b32.xlu1 %v1783_v22, %s1876_s1  ;;  %1774 = vrot.lane.b32.xlu0 %v1783_v22, %s1877_s4  ;;  %v326_v25 = vsel %vm275_vm2, %v2013_v23, 0 }
  0xeb   :  { %1636 = vmatprep.subr.bf16.mxu1 %v1874_v0 }
  0xee   :  { %1789 = vrot.lane.b32.xlu1 %v1788_v15, %s1876_s1  ;;  %1779 = vrot.lane.b32.xlu0 %v1788_v15, %s1877_s4 }
  0xf0   :  { %1633 = vmatmul.mubr.msk.bf16.vlgmr.msra.gmra.mrb[8].mxu1 %vm275_vm2, %v224_v24 }
  0xf1   :  { %1637 = vmatpush3.bf16.xpose.msra.mxu1 %v326_v25  ;;  %1638 = vmatprep.mubr.msk.bf16.mxu1 %vm1875_vm0, %v1874_v0 }
  0xf2   :  { %1799 = vrot.lane.b32.xlu1 %v1788_v15, %s1878_s17  ;;  %1794 = vrot.lane.b32.xlu0 %v1783_v22, %s1878_s17  ;;  %v267_v15 = vsub.s32 0, %v247_v9 }
  0xf3   :  { %1648 = vmatprep.subr.bf16.mxu1 %v1874_v0 }
  0xf4   :  { %v268_v16 = vrot.slane %v257_v14, %v267_v15 }
  0xf6   :  { %749 = vrot.lane.b32.xlu1 %v232_v18, %s1879_s18 }
  0xf8   :  { %1639 = vmatmul.mubr.msk.bf16.vlgmr.msra.gmra.mrb[12].mxu1 %vm275_vm2, %v225_v26 }
  0xf9   :  { %1650 = vmatprep.mubr.msk.bf16.mxu1 %vm1875_vm0, %v1874_v0 }
 0x15c   :  { %v1775_v27 = vpop.permute.xlu0 %1774  ;;  %v1785_v30 = vpop.permute.xlu1 %1784 }
 0x15d   :  { %v1777_v28 = vunpack.i.h.bf16 %v1775_v27  ;;  %v1776_v29 = vunpack.i.l.bf16 %v1775_v27  ;;  %v1786_v34 = vunpack.i.l.bf16 %v1785_v30  ;;  %v1787_v37 = vunpack.i.h.bf16 %v1785_v30 }
 0x15e   :  { %v272_v27 = vrot.slane %v264_v21, %v267_v15 }
 0x15f   :  { %v2025_v31 = vpack.c.bf16 %v1777_v28, %v1777_v28  ;;  %v2027_v32 = vpack.c.bf16 %v1776_v29, %v1776_v29  ;;  %v2035_v40 = vpack.c.bf16 %v1786_v34, %v1786_v34  ;;  %v2037_v41 = vpack.c.bf16 %v1787_v37, %v1787_v37 }
 0x160   :  { %v1780_v33 = vpop.permute.xlu0 %1779  ;;  %v1790_v44 = vpop.permute.xlu1 %1789 }
 0x161   :  { %v372_v35 = vsel %vm275_vm2, %v2027_v32, 0  ;;  %v418_v36 = vsel %vm275_vm2, %v2025_v31, 0  ;;  %v1781_v38 = vunpack.i.l.bf16 %v1780_v33  ;;  %v1782_v39 = vunpack.i.h.bf16 %v1780_v33 }
 0x162   :  { %1643 = vmatpush3.bf16.xpose.msra.mxu0 %v372_v35  ;;  %1649 = vmatpush3.bf16.xpose.msra.mxu1 %v418_v36  ;;  %v464_v47 = vsel %vm275_vm2, %v2035_v40, 0  ;;  %v510_v49 = vsel %vm275_vm2, %v2037_v41, 0  ;;  %v1791_v50 = vunpack.i.l.bf16 %v1790_v44  ;;  %v1792_v51 = vunpack.i.h.bf16 %v1790_v44 }
 0x163   :  { %1654 = vmatprep.subr.bf16.mxu0 %v1874_v0  ;;  %1660 = vmatprep.subr.bf16.mxu1 %v1874_v0  ;;  %v226_v43 = vpack.c.bf16 %v1781_v38, %v1781_v38  ;;  %v227_v45 = vpack.c.bf16 %v1782_v39, %v1782_v39 }
 0x164   :  { %v1795_v42 = vpop.permute.xlu0 %1794  ;;  %v228_v54 = vpack.c.bf16 %v1791_v50, %v1791_v50  ;;  %v229_v55 = vpack.c.bf16 %v1792_v51, %v1792_v51  ;;  %v1800_v56 = vpop.permute.xlu1 %1799 }
 0x165   :  { %v1796_v46 = vunpack.i.l.bf16 %v1795_v42  ;;  %v1797_v48 = vunpack.i.h.bf16 %v1795_v42  ;;  %v1801_v59 = vunpack.i.l.bf16 %v1800_v56  ;;  %v1802_v60 = vunpack.i.h.bf16 %v1800_v56 }
 0x167   :  { %v2050_v52 = vpack.c.bf16 %v1796_v46, %v1796_v46  ;;  %v2053_v53 = vpack.c.bf16 %v1797_v48, %v1797_v48  ;;  %v230_v62 = vpack.c.bf16 %v1801_v59, %v1801_v59  ;;  %v231_v63 = vpack.c.bf16 %v1802_v60, %v1802_v60 }
 0x168   :  { %v750_v61 = vpop.permute.xlu1 %749 }
 0x169   :  { %1645 = vmatmul.mubr.msk.bf16.vlgmr.msra.gmra.mrb[0].mxu0 %vm275_vm2, %v226_v43  ;;  %1651 = vmatmul.mubr.msk.bf16.vlgmr.msra.gmra.mrb[16].mxu1 %vm275_vm2, %v227_v45  ;;  %v556_v57 = vsel %vm275_vm2, %v2050_v52, 0  ;;  %v602_v58 = vsel %vm275_vm2, %v2053_v53, 0  ;;  %v756_v1 = vsel %vm754_vm3, %v750_v61, 0 }
 0x16a   :  { %1655 = vmatpush3.bf16.xpose.msra.mxu0 %v464_v47  ;;  %1661 = vmatpush3.bf16.xpose.msra.mxu1 %v510_v49 }
 0x16b   :  { %1656 = vmatprep.mubr.msk.bf16.mxu0 %vm1875_vm0, %v1874_v0  ;;  %1662 = vmatprep.mubr.msk.bf16.mxu1 %vm1875_vm0, %v1874_v0 }
 0x16c   :  { %1666 = vmatprep.subr.bf16.mxu0 %v1874_v0  ;;  %1672 = vmatprep.subr.bf16.mxu1 %v1874_v0 }
 0x171   :  { %1657 = vmatmul.mubr.msk.bf16.vlgmr.msra.gmra.mrb[4].mxu0 %vm275_vm2, %v228_v54  ;;  %1663 = vmatmul.mubr.msk.bf16.vlgmr.msra.gmra.mrb[20].mxu1 %vm275_vm2, %v229_v55 }
 0x172   :  { %1667 = vmatpush3.bf16.xpose.msra.mxu0 %v556_v57  ;;  %1673 = vmatpush3.bf16.xpose.msra.mxu1 %v602_v58 }
 0x173   :  { %1668 = vmatprep.mubr.msk.bf16.mxu0 %vm1875_vm0, %v1874_v0  ;;  %1674 = vmatprep.mubr.msk.bf16.mxu1 %vm1875_vm0, %v1874_v0 }
 0x174   :  { %1678 = vmatprep.subr.bf16.mxu0 %v1874_v0  ;;  %1684 = vmatprep.subr.bf16.mxu1 %v1874_v0 }
 0x179   :  { %1669 = vmatmul.mubr.msk.bf16.vlgmr.msra.gmra.mrb[8].mxu0 %vm275_vm2, %v230_v62  ;;  %1675 = vmatmul.mubr.msk.bf16.vlgmr.msra.gmra.mrb[24].mxu1 %vm275_vm2, %v231_v63 }
 0x17a   :  { %1679 = vmatpush3.bf16.msra.mxu0 %v756_v1  ;;  %1686 = vmatprep.mubr.msk.bf16.mxu1 %vm1875_vm0, %v1874_v0 }
 0x17b   :  { %1680 = vmatprep.mubr.msk.bf16.mxu0 %vm1875_vm0, %v1874_v0  ;;  %1690 = vmatprep.subr.bf16.mxu0 %v1874_v0 }
 0x1c3   :  { %v316_v18 = vpop.f32.mrb[8].mxu1 }
 0x1c4   :  { %v317_v19 = vadd.f32 %v316_v18, %v268_v16  ;;  %v1634_v20 = vpop.f32.mrb[9].mxu1 }
 0x1c5   :  { %v319_v22 = vpop.f32.mrb[10].mxu1 }
 0x1c6   :  { %v2078_v24 = vmul.f32 0.17677669, %v317_v19  ;;  %v1635_v25 = vpop.f32.mrb[11].mxu1 }
 0x1c8   :  { %v652_v26 = vsel %vm275_vm2, %v2078_v24, -inf }
 0x1c9   :  { %653 = vmax.xlane.f32.xlu0 %v652_v26 }
 0x1cb   :  { %v362_v28 = vpop.f32.mrb[12].mxu1 }
 0x1cc   :  { %v363_v29 = vadd.f32 %v362_v28, %v272_v27  ;;  %v1640_v30 = vpop.f32.mrb[13].mxu1 }
 0x1cd   :  { %v365_v33 = vpop.f32.mrb[14].mxu1 }
 0x1ce   :  { %v645_v34 = vmul.f32 0.17677669, %v363_v29  ;;  %v1641_v35 = vpop.f32.mrb[15].mxu1 }
 0x1d0   :  { %v655_v36 = vsel %vm275_vm2, %v645_v34, -inf }
 0x1d1   :  { %656 = vmax.xlane.f32.xlu1 %v655_v36 }
 0x23c   :  { %v408_v37 = vpop.f32.mrb[0].mxu0  ;;  %v454_v39 = vpop.f32.mrb[16].mxu1 }
 0x23d   :  { %v409_v38 = vadd.f32 %v408_v37, %v268_v16  ;;  %v1646_v42 = vpop.f32.mrb[1].mxu0  ;;  %v455_v43 = vadd.f32 %v454_v39, %v272_v27  ;;  %v1652_v44 = vpop.f32.mrb[17].mxu1 }
 0x23e   :  { %v411_v45 = vpop.f32.mrb[2].mxu0  ;;  %v457_v47 = vpop.f32.mrb[18].mxu1 }
 0x23f   :  { %v646_v46 = vmul.f32 0.17677669, %v409_v38  ;;  %v1647_v48 = vpop.f32.mrb[3].mxu0  ;;  %v1653_v49 = vpop.f32.mrb[19].mxu1  ;;  %v647_v50 = vmul.f32 0.17677669, %v455_v43 }
 0x241   :  { %v658_v51 = vsel %vm275_vm2, %v646_v46, -inf  ;;  %v661_v58 = vsel %vm275_vm2, %v647_v50, -inf }
 0x242   :  { %659 = vmax.xlane.f32.xlu0 %v658_v51 }
 0x244   :  { %v500_v54 = vpop.f32.mrb[4].mxu0  ;;  %v546_v56 = vpop.f32.mrb[20].mxu1 }
 0x245   :  { %v501_v55 = vadd.f32 %v500_v54, %v268_v16  ;;  %v1658_v57 = vpop.f32.mrb[5].mxu0  ;;  %v547_v59 = vadd.f32 %v546_v56, %v272_v27  ;;  %v1664_v60 = vpop.f32.mrb[21].mxu1 }
 0x246   :  { %v503_v61 = vpop.f32.mrb[6].mxu0  ;;  %662 = vmax.xlane.f32.xlu0 %v661_v58  ;;  %v549_v63 = vpop.f32.mrb[22].mxu1 }
 0x247   :  { %v2085_v62 = vmul.f32 0.17677669, %v501_v55  ;;  %v1659_v1 = vpop.f32.mrb[7].mxu0  ;;  %v2087_v2 = vmul.f32 0.17677669, %v547_v59  ;;  %v1665_v5 = vpop.f32.mrb[23].mxu1 }
 0x249   :  { %v664_v6 = vsel %vm275_vm2, %v2085_v62, -inf  ;;  %v667_v7 = vsel %vm275_vm2, %v2087_v2, -inf }
 0x24a   :  { %665 = vmax.xlane.f32.xlu1 %v664_v6  ;;  %668 = vmax.xlane.f32.xlu0 %v667_v7 }
 0x24c   :  { %v592_v8 = vpop.f32.mrb[8].mxu0  ;;  %v638_v10 = vpop.f32.mrb[24].mxu1 }
 0x24d   :  { %v593_v9 = vadd.f32 %v592_v8, %v268_v16  ;;  %v1670_v11 = vpop.f32.mrb[9].mxu0  ;;  %v639_v12 = vadd.f32 %v638_v10, %v272_v27  ;;  %v1676_v13 = vpop.f32.mrb[25].mxu1 }
 0x24e   :  { %v595_v14 = vpop.f32.mrb[10].mxu0  ;;  %v641_v17 = vpop.f32.mrb[26].mxu1 }
 0x24f   :  { %v650_v15 = vmul.f32 0.17677669, %v593_v9  ;;  %v1671_v18 = vpop.f32.mrb[11].mxu0  ;;  %v651_v19 = vmul.f32 0.17677669, %v639_v12  ;;  %v1677_v20 = vpop.f32.mrb[27].mxu1 }
 0x251   :  { %v670_v21 = vsel %vm275_vm2, %v650_v15, -inf  ;;  %v673_v22 = vsel %vm275_vm2, %v651_v19, -inf }
 0x252   :  { %671 = vmax.xlane.f32.xlu1 %v670_v21  ;;  %674 = vmax.xlane.f32.xlu0 %v673_v22 }
 0x256   :  { %v654_v25 = vpop.xlane.xlu0 %653 }
 0x257   :  { %v676_v27 = vsub.f32 %v2078_v24, %v654_v25 }
 0x259   :  { %v684_v29 = vmul.f32 1.442695, %v676_v27 }
 0x25e   :  { %v657_v16 = vpop.xlane.xlu1 %656 }
 0x25f   :  { %v677_v26 = vsub.f32 %v645_v34, %v657_v16 }
 0x261   :  { %v686_v28 = vmul.f32 1.442695, %v677_v26 }
 0x263   :  { %848 = vrot.lane.b32.xlu1 %v2027_v32, %s1879_s18  ;;  %1834 = vpow2.f32 %v686_v28 }
 0x264   :  { %1836 = vpow2.f32 %v684_v29 }
 0x267   :  { %897 = vrot.lane.b32.xlu1 %v2025_v31, %s1879_s18 }
 0x268   :  { %799 = vrot.lane.b32.xlu0 %v2013_v23, %s1879_s18 }
 0x26d   :  { %v1835_v30 = vpop.eup %1834 }
 0x26e   :  { %v2102_v33 = vpop.eup %1836  ;;  %v703_v32 = vsel %vm275_vm2, %v1835_v30, 0.0 }
 0x26f   :  { %v700_v31 = vsel %vm275_vm2, %v2102_v33, 0.0 }
 0x287   :  { %704 = vadd.xlane.f32.xlu0 %v703_v32 }
 0x28b   :  { %701 = vadd.xlane.f32.xlu1 %v700_v31 }
 0x2cf   :  { %v660_v23 = vpop.xlane.xlu0 %659 }
 0x2d0   :  { %v678_v35 = vsub.f32 %v646_v46, %v660_v23 }
 0x2d2   :  { %v688_v36 = vmul.f32 1.442695, %v678_v35 }
 0x2d3   :  { %v663_v34 = vpop.xlane.xlu0 %662 }
 0x2d4   :  { %1838 = vpow2.f32 %v688_v36  ;;  %v679_v24 = vsub.f32 %v647_v50, %v663_v34 }
 0x2d6   :  { %v690_v37 = vmul.f32 1.442695, %v679_v24 }
 0x2d7   :  { %v669_v38 = vpop.xlane.xlu0 %668  ;;  %v666_v48 = vpop.xlane.xlu1 %665 }
 0x2d8   :  { %1840 = vpow2.f32 %v690_v37  ;;  %v680_v49 = vsub.f32 %v2085_v62, %v666_v48  ;;  %v681_v51 = vsub.f32 %v2087_v2, %v669_v38 }
 0x2da   :  { %v692_v54 = vmul.f32 1.442695, %v680_v49  ;;  %v694_v56 = vmul.f32 1.442695, %v681_v51 }
 0x2dc   :  { %1842 = vpow2.f32 %v692_v54 }
 0x2dd   :  { %1844 = vpow2.f32 %v694_v56 }
 0x2de   :  { %v2107_v39 = vpop.eup %1838 }
 0x2df   :  { %v706_v42 = vsel %vm275_vm2, %v2107_v39, 0.0  ;;  %v675_v43 = vpop.xlane.xlu0 %674  ;;  %v672_v50 = vpop.xlane.xlu1 %671 }
 0x2e0   :  { %707 = vadd.xlane.f32.xlu1 %v706_v42  ;;  %v682_v55 = vsub.f32 %v650_v15, %v672_v50  ;;  %v683_v58 = vsub.f32 %v651_v19, %v675_v43 }
 0x2e2   :  { %v2111_v44 = vpop.eup %1840  ;;  %v696_v57 = vmul.f32 1.442695, %v682_v55  ;;  %v698_v59 = vmul.f32 1.442695, %v683_v58 }
 0x2e3   :  { %v709_v45 = vsel %vm275_vm2, %v2111_v44, 0.0  ;;  %v800_v46 = vpop.permute.xlu0 %799  ;;  %v849_v60 = vpop.permute.xlu1 %848 }
 0x2e4   :  { %710 = vadd.xlane.f32.xlu0 %v709_v45  ;;  %v805_v47 = vsel %vm754_vm3, %v800_v46, 0  ;;  %1846 = vpow2.f32 %v696_v57  ;;  %v854_v17 = vsel %vm754_vm3, %v849_v60, 0 }
 0x2e5   :  { %1685 = vmatpush3.bf16.msra.mxu1 %v805_v47  ;;  %1848 = vpow2.f32 %v698_v59 }
 0x2e6   :  { %1696 = vmatprep.subr.bf16.mxu1 %v1874_v0 }
 0x2e7   :  { %v898_v61 = vpop.permute.xlu1 %897 }
 0x2e8   :  { %v903_v14 = vsel %vm754_vm3, %v898_v61, 0 }
 0x2f1   :  { %995 = vrot.lane.b32.xlu1 %v2037_v41, %s1879_s18  ;;  %v2123_v41 = vpop.eup %1842 }
 0x2f2   :  { %v712_v62 = vsel %vm275_vm2, %v2123_v41, 0.0 }
 0x2fa   :  { %946 = vrot.lane.b32.xlu0 %v2035_v40, %s1879_s18  ;;  %v2125_v40 = vpop.eup %1844 }
 0x2fb   :  { %v2129_v63 = vpop.eup %1846  ;;  %v715_v6 = vsel %vm275_vm2, %v2125_v40, 0.0 }
 0x2fc   :  { %v718_v5 = vsel %vm275_vm2, %v2129_v63, 0.0  ;;  %v2135_v7 = vpop.eup %1848 }
 0x2fd   :  { %v721_v8 = vsel %vm275_vm2, %v2135_v7, 0.0 }
 0x314   :  { %v705_v1 = vpop.xlane.xlu0 %704 }
 0x315   :  { %713 = vadd.xlane.f32.xlu1 %v712_v62  ;;  %1850 = vrcp.f32 %v705_v1 }
 0x318   :  { %v702_v2 = vpop.xlane.xlu1 %701 }
 0x319   :  { %1852 = vrcp.f32 %v702_v2  ;;  %719 = vadd.xlane.f32.xlu1 %v718_v5  ;;  %716 = vadd.xlane.f32.xlu0 %v715_v6  ;;  %v1822_v5 = vld [vmem:[%s2282_s5] sm:$0xff]  }
 0x31d   :  { %722 = vadd.xlane.f32.xlu0 %v721_v8 }
 0x31f   :  { %v1851_v9 = vpop.eup %1850 }
 0x320   :  { %v733_v10 = vmul.f32 %v1851_v9, %v1835_v30 }
 0x322   :  { %v741_v12 = vpack.c.bf16 %v733_v10, %v733_v10  ;;  %v1823_v10 = vld [vmem:[%s2282_s5 + $0x8] sm:$0xff]  }
 0x323   :  { %v1853_v11 = vpop.eup %1852 }
 0x324   :  { %v732_v13 = vmul.f32 %v1853_v11, %v2102_v33  ;;  %1687 = vmatmul.mubr.msk.bf16.vlgmr.msra.gmra.mrb[28].mxu1 %vm275_vm2, %v741_v12 }
 0x325   :  { %1697 = vmatpush3.bf16.msra.mxu1 %v903_v14  ;;  %1698 = vmatprep.mubr.msk.bf16.mxu1 %vm1875_vm0, %v1874_v0 }
 0x326   :  { %v740_v15 = vpack.c.bf16 %v732_v13, %v732_v13  ;;  %1708 = vmatprep.subr.bf16.mxu1 %v1874_v0 }
 0x328   :  { %1681 = vmatmul.mubr.msk.bf16.vlgmr.msra.gmra.mrb[12].mxu0 %vm275_vm2, %v740_v15 }
 0x329   :  { %1691 = vmatpush3.bf16.msra.mxu0 %v854_v17  ;;  %1692 = vmatprep.mubr.msk.bf16.mxu0 %vm1875_vm0, %v1874_v0 }
 0x32a   :  { %1093 = vrot.lane.b32.xlu1 %v2053_v53, %s1879_s18  ;;  %1702 = vmatprep.subr.bf16.mxu0 %v1874_v0 }
 0x333   :  { %1044 = vrot.lane.b32.xlu0 %v2050_v52, %s1879_s18 }
 0x36d   :  { %v708_v18 = vpop.xlane.xlu1 %707 }
 0x36e   :  { %1854 = vrcp.f32 %v708_v18 }
 0x371   :  { %v711_v19 = vpop.xlane.xlu0 %710  ;;  %v996_v53 = vpop.permute.xlu1 %995 }
 0x372   :  { %1856 = vrcp.f32 %v711_v19  ;;  %v1001_v28 = vsel %vm754_vm3, %v996_v53, 0 }
 0x375   :  { %v947_v22 = vpop.permute.xlu0 %946 }
 0x376   :  { %v952_v27 = vsel %vm754_vm3, %v947_v22, 0 }
 0x378   :  { %v1855_v20 = vpop.eup %1854 }
 0x379   :  { %v734_v21 = vmul.f32 %v1855_v20, %v2107_v39 }
 0x37b   :  { %v742_v16 = vpack.c.bf16 %v734_v21, %v734_v21 }
 0x37c   :  { %v1857_v25 = vpop.eup %1856 }
 0x37d   :  { %v735_v26 = vmul.f32 %v1857_v25, %v2111_v44  ;;  %1693 = vmatmul.mubr.msk.bf16.vlgmr.msra.gmra.mrb[16].mxu0 %vm275_vm2, %v742_v16 }
 0x37e   :  { %1703 = vmatpush3.bf16.msra.mxu0 %v952_v27  ;;  %1704 = vmatprep.mubr.msk.bf16.mxu0 %vm1875_vm0, %v1874_v0 }
 0x37f   :  { %v743_v52 = vpack.c.bf16 %v735_v26, %v735_v26  ;;  %1714 = vmatprep.subr.bf16.mxu0 %v1874_v0 }
 0x381   :  { %1699 = vmatmul.mubr.msk.bf16.vlgmr.msra.gmra.mrb[32].mxu1 %vm275_vm2, %v743_v52 }
 0x382   :  { %1709 = vmatpush3.bf16.msra.mxu1 %v1001_v28  ;;  %1710 = vmatprep.mubr.msk.bf16.mxu1 %vm1875_vm0, %v1874_v0 }
 0x383   :  { %1720 = vmatprep.subr.bf16.mxu1 %v1874_v0 }
 0x3a2   :  { %v714_v29 = vpop.xlane.xlu1 %713 }
 0x3a3   :  { %1858 = vrcp.f32 %v714_v29 }
 0x3a6   :  { %v720_v30 = vpop.xlane.xlu1 %719  ;;  %v717_v33 = vpop.xlane.xlu0 %716 }
 0x3a7   :  { %1860 = vrcp.f32 %v720_v30 }
 0x3a8   :  { %1862 = vrcp.f32 %v717_v33 }
 0x3aa   :  { %v723_v32 = vpop.xlane.xlu0 %722  ;;  %v1094_v42 = vpop.permute.xlu1 %1093 }
 0x3ab   :  { %1864 = vrcp.f32 %v723_v32  ;;  %v1099_v45 = vsel %vm754_vm3, %v1094_v42, 0 }
 0x3ad   :  { %v1859_v31 = vpop.eup %1858 }
 0x3ae   :  { %v736_v23 = vmul.f32 %v1859_v31, %v2123_v41  ;;  %v1045_v35 = vpop.permute.xlu0 %1044 }
 0x3af   :  { %v1050_v37 = vsel %vm754_vm3, %v1045_v35, 0 }
 0x3b0   :  { %v744_v36 = vpack.c.bf16 %v736_v23, %v736_v23 }
 0x3b1   :  { %v1861_v34 = vpop.eup %1860 }
 0x3b2   :  { %v1863_v24 = vpop.eup %1862  ;;  %1705 = vmatmul.mubr.msk.bf16.vlgmr.msra.gmra.mrb[20].mxu0 %vm275_vm2, %v744_v36  ;;  %v738_v39 = vmul.f32 %v1861_v34, %v2129_v63 }
 0x3b3   :  { %v737_v38 = vmul.f32 %v1863_v24, %v2125_v40  ;;  %1715 = vmatpush3.bf16.msra.mxu0 %v1050_v37  ;;  %1716 = vmatprep.mubr.msk.bf16.mxu0 %vm1875_vm0, %v1874_v0 }
 0x3b4   :  { %1726 = vmatprep.subr.bf16.mxu0 %v1874_v0  ;;  %v746_v46 = vpack.c.bf16 %v738_v39, %v738_v39  ;;  %v1540_v39 = vld [vmem:[%s2283_s6] ss:$0 sm:$0xff] }
 0x3b5   :  { %v745_v43 = vpack.c.bf16 %v737_v38, %v737_v38  ;;  %v1865_v44 = vpop.eup %1864 }
 0x3b6   :  { %v739_v47 = vmul.f32 %v1865_v44, %v2135_v7 }
 0x3b7   :  { %1711 = vmatmul.mubr.msk.bf16.vlgmr.msra.gmra.mrb[36].mxu1 %vm275_vm2, %v745_v43 }
 0x3b8   :  { %1721 = vmatpush3.bf16.msra.mxu1 %v1099_v45  ;;  %1722 = vmatprep.mubr.msk.bf16.mxu1 %vm1875_vm0, %v1874_v0  ;;  %v747_v48 = vpack.c.bf16 %v739_v47, %v739_v47 }
 0x3b9   :  { %1734 = vmatprep.subr.bf16.mxu1 %v1874_v0 }
 0x3ba   :  { %1717 = vmatmul.mubr.msk.bf16.vlgmr.msra.gmra.mrb[24].mxu0 %vm275_vm2, %v746_v46 }
 0x3bb   :  { %1730 = vmatprep.mubr.msk.bf16.mxu0 %vm1875_vm0, %v1874_v0  ;;  %1727 = vmatpush3.bf16.msra.mxu0 %v1822_v5  ;;  %v1830_v5 = vld [vmem:[%s2285_s11 + $0x20] sm:$0xff]  }
 0x3bc   :  { %1728 = vmatprep.subr.bf16.mxu0 %v1874_v0 }
 0x3bf   :  { %1723 = vmatmul.mubr.msk.bf16.vlgmr.msra.gmra.mrb[40].mxu1 %vm275_vm2, %v747_v48  ;;  %1729 = vmatpush3.bf16.msra.mxu0 %v1823_v10 }
 0x3c0   :  { %1738 = vmatprep.mubr.msk.bf16.mxu1 %vm1875_vm0, %v1874_v0  ;;  %1742 = vmatprep.subr.bf16.mxu0 %v1874_v0 }
 0x3f7   :  { %v841_v49 = vpop.f32.mrb[28].mxu1 }
 0x3f8   :  { %v1688_v50 = vpop.f32.mrb[29].mxu1 }
 0x3f9   :  { %v844_v51 = vpop.f32.mrb[30].mxu1 }
 0x3fa   :  { %v1689_v54 = vpop.f32.mrb[31].mxu1 }
 0x3fb   :  { %v792_v55 = vpop.f32.mrb[12].mxu0 }
 0x3fc   :  { %v1682_v56 = vpop.f32.mrb[13].mxu0 }
 0x3fd   :  { %v795_v57 = vpop.f32.mrb[14].mxu0 }
 0x3fe   :  { %v1683_v58 = vpop.f32.mrb[15].mxu0 }
 0x450   :  { %v890_v59 = vpop.f32.mrb[16].mxu0 }
 0x451   :  { %v1694_v60 = vpop.f32.mrb[17].mxu0 }
 0x452   :  { %v893_v41 = vpop.f32.mrb[18].mxu0 }
 0x453   :  { %v1695_v40 = vpop.f32.mrb[19].mxu0 }
 0x454   :  { %v939_v61 = vpop.f32.mrb[32].mxu1 }
 0x455   :  { %v1803_v62 = vpack.i.bf16 %v939_v61, %v890_v59  ;;  %v1700_v63 = vpop.f32.mrb[33].mxu1  ;;  %v1825_v61 = vld [vmem:[%s2284_s9 + $0x8] sm:$0xff]  }
 0x456   :  { %v942_v1 = vpop.f32.mrb[34].mxu1  ;;  %v1827_v63 = vld [vmem:[%s2285_s11 + $0x8] sm:$0xff]  }
 0x457   :  { %1804 = vrot.lane.b32.xlu0 %v1803_v62, %s1882_s2  ;;  %v1701_v2 = vpop.f32.mrb[35].mxu1  ;;  %v1826_v62 = vld [vmem:[%s2285_s11] sm:$0xff]   ;;  %v1828_v1 = vld [vmem:[%s2285_s11 + $0x10] sm:$0xff]  }
 0x458   :  { %v1829_v2 = vld [vmem:[%s2285_s11 + $0x18] sm:$0xff]  }
 0x485   :  { %v988_v6 = vpop.f32.mrb[20].mxu0 }
 0x486   :  { %v1706_v7 = vpop.f32.mrb[21].mxu0 }
 0x487   :  { %v991_v8 = vpop.f32.mrb[22].mxu0 }
 0x488   :  { %v1707_v9 = vpop.f32.mrb[23].mxu0 }
 0x48a   :  { %v1037_v11 = vpop.f32.mrb[36].mxu1 }
 0x48b   :  { %v1808_v12 = vpack.i.bf16 %v1037_v11, %v988_v6  ;;  %v1712_v13 = vpop.f32.mrb[37].mxu1  ;;  %v1831_v6 = vld [vmem:[%s2285_s11 + $0x28] sm:$0xff]  }
 0x48c   :  { %v1040_v14 = vpop.f32.mrb[38].mxu1 }
 0x48d   :  { %1809 = vrot.lane.b32.xlu1 %v1808_v12, %s1883_s25  ;;  %v1713_v15 = vpop.f32.mrb[39].mxu1  ;;  %v1086_v17 = vpop.f32.mrb[24].mxu0  ;;  %v1544_v14 = vld [vmem:[%s2286_s7] ss:$0 sm:$0xff] }
 0x48e   :  { %v1718_v18 = vpop.f32.mrb[25].mxu0 }
 0x48f   :  { %v1089_v19 = vpop.f32.mrb[26].mxu0 }
 0x490   :  { %v1719_v20 = vpop.f32.mrb[27].mxu0 }
 0x491   :  { %v1545_v20 = vld [vmem:[%s2287_s8] ss:$0 sm:$0xff] }
 0x492   :  { %v1135_v21 = vpop.f32.mrb[40].mxu1 }
 0x493   :  { %v1813_v22 = vpack.i.bf16 %v1135_v21, %v1086_v17  ;;  %v1724_v16 = vpop.f32.mrb[41].mxu1 }
 0x494   :  { %v1138_v25 = vpop.f32.mrb[42].mxu1 }
 0x495   :  { %1814 = vrot.lane.b32.xlu0 %v1813_v22, %s1884_s3  ;;  %v1725_v26 = vpop.f32.mrb[43].mxu1 }
 0x496   :  { %v1832_v26 = vld [vmem:[%s2285_s11 + $0x30] sm:$0xff]  }
 0x4c9   :  { %v1805_v27 = vpop.permute.xlu0 %1804 }
 0x4ca   :  { %v1807_v52 = vunpack.i.h.bf16 %v1805_v27  ;;  %v1806_v28 = vunpack.i.l.bf16 %v1805_v27  ;;  %v1833_v27 = vld [vmem:[%s2285_s11 + $0x38] sm:$0xff]  }
 0x4cc   :  { %v1166_v32 = vsel %vm275_vm2, %v841_v49, %v1807_v52  ;;  %v1165_v31 = vsel %vm275_vm2, %v792_v55, %v1806_v28 }
 0x4ff   :  { %v1810_v53 = vpop.permute.xlu1 %1809 }
 0x500   :  { %v1812_v29 = vunpack.i.h.bf16 %v1810_v53  ;;  %v1811_v30 = vunpack.i.l.bf16 %v1810_v53  ;;  %v1546_v53 = vld [vmem:[%s2288_s10] ss:$0 sm:$0xff] }
 0x502   :  { %v1169_v36 = vsel %vm1167_vm5, %v1166_v32, %v1812_v29  ;;  %v1168_v34 = vsel %vm1167_vm5, %v1165_v31, %v1811_v30 }
 0x507   :  { %v1815_v33 = vpop.permute.xlu0 %1814 }
 0x508   :  { %v1817_v23 = vunpack.i.h.bf16 %v1815_v33  ;;  %v1816_v35 = vunpack.i.l.bf16 %v1815_v33 }
 0x50a   :  { %v1172_v24 = vsel %vm1170_vm6, %v1169_v36, %v1817_v23  ;;  %v1171_v37 = vsel %vm1170_vm6, %v1168_v34, %v1816_v35 }
 0x50b   :  { %v1173_v38 = vpack.c.bf16 %v1172_v24, %v1171_v37 }
 0x50d   :  { %1731 = vmatmul.mubr.msk.bf16.vlgmr.msra.gmra.mrb[28].mxu0 %vm82_vm1, %v1173_v38 }
 0x50e   :  { %1758 = vmatprep.mubr.msk.bf16.mxu0 %vm1875_vm0, %v1874_v0  ;;  %1743 = vmatpush3.bf16.msra.mxu0 %v1826_v62 }
 0x50f   :  { %1744 = vmatprep.subr.bf16.mxu0 %v1874_v0 }
 0x512   :  { %1745 = vmatpush3.bf16.msra.mxu0 %v1827_v63 }
 0x513   :  { %1746 = vmatprep.subr.bf16.mxu0 %v1874_v0 }
 0x516   :  { %1747 = vmatpush3.bf16.msra.mxu0 %v1828_v1  ;;  %v1560_v1 = vld [vmem:[%s2291_s14] ss:$0 sm:$0xff] }
 0x517   :  { %1748 = vmatprep.subr.bf16.mxu0 %v1874_v0 }
 0x51a   :  { %1749 = vmatpush3.bf16.msra.mxu0 %v1829_v2 }
 0x51b   :  { %1750 = vmatprep.subr.bf16.mxu0 %v1874_v0 }
 0x51e   :  { %1751 = vmatpush3.bf16.msra.mxu0 %v1830_v5 }
 0x51f   :  { %1752 = vmatprep.subr.bf16.mxu0 %v1874_v0 }
 0x522   :  { %1753 = vmatpush3.bf16.msra.mxu0 %v1831_v6 }
 0x523   :  { %1754 = vmatprep.subr.bf16.mxu0 %v1874_v0 }
 0x526   :  { %1755 = vmatpush3.bf16.msra.mxu0 %v1832_v26 }
 0x527   :  { %1756 = vmatprep.subr.bf16.mxu0 %v1874_v0 }
 0x52a   :  { %1757 = vmatpush3.bf16.msra.mxu0 %v1833_v27 }
 0x5e0   :  { %v1229_v42 = vpop.f32.mrb[28].mxu0 }
 0x5e1   :  { %v1230_v43 = vadd.f32 %v1540_v39, %v1229_v42  ;;  %v1732_v44 = vpop.f32.mrb[29].mxu0 }
 0x5e2   :  { %v1232_v45 = vpop.f32.mrb[30].mxu0 }
 0x5e3   :  { %v1233_v46 = vadd.f32 %v1540_v39, %v1232_v45  ;;  %v1733_v47 = vpop.f32.mrb[31].mxu0  ;;  %v1236_v48 = vadd.f32 %v1230_v43, %v1980_v3 }
 0x5e5   :  { %v1240_v49 = vsel %vm82_vm1, %v1236_v48, 0.0  ;;  %v1237_v50 = vadd.f32 %v1233_v46, %v1985_v4  ;;  %v1824_v4 = vld [vmem:[%s2284_s9] sm:$0xff]  }
 0x5e6   :  { %1241 = vadd.xlane.f32.xlu1 %v1240_v49  ;;  %1735 = vmatpush3.bf16.msra.mxu1 %v1824_v4 }
 0x5e7   :  { %v1243_v51 = vsel %vm82_vm1, %v1237_v50, 0.0  ;;  %1736 = vmatprep.subr.bf16.mxu1 %v1874_v0  ;;  %v1550_v0 = vld [vmem:[%s2289_s12] ss:$0 sm:$0xff] }
 0x5e8   :  { %1244 = vadd.xlane.f32.xlu0 %v1243_v51 }
 0x5ea   :  { %1737 = vmatpush3.bf16.msra.mxu1 %v1825_v61  ;;  %v1559_v61 = vld [vmem:[%s2290_s13] ss:$0 sm:$0xff] }
 0x673   :  { %v1242_v54 = vpop.xlane.xlu1 %1241 }
 0x674   :  { %v1247_v55 = vmul.f32 0.03125, %v1242_v54 }
 0x675   :  { %v1245_v56 = vpop.xlane.xlu0 %1244 }
 0x676   :  { %v1249_v57 = vsub.f32 %v1236_v48, %v1247_v55  ;;  %v1248_v58 = vmul.f32 0.03125, %v1245_v56 }
 0x678   :  { %v1250_v59 = vsub.f32 %v1237_v50, %v1248_v58  ;;  %v1251_v60 = vmul.f32 %v1249_v57, %v1249_v57 }
 0x67a   :  { %v1253_v41 = vsel %vm82_vm1, %v1251_v60, 0.0  ;;  %v1252_v40 = vmul.f32 %v1250_v59, %v1250_v59 }
 0x67b   :  { %1254 = vadd.xlane.f32.xlu0 %v1253_v41 }
 0x67c   :  { %v1256_v3 = vsel %vm82_vm1, %v1252_v40, 0.0 }
 0x67d   :  { %1257 = vadd.xlane.f32.xlu1 %v1256_v3 }
 0x708   :  { %v1255_v7 = vpop.xlane.xlu0 %1254 }
 0x709   :  { %v1259_v8 = vmul.f32 0.03125, %v1255_v7 }
 0x70a   :  { %v1258_v9 = vpop.xlane.xlu1 %1257 }
 0x70b   :  { %v1261_v10 = vadd.f32 1e-05, %v1259_v8  ;;  %v1260_v11 = vmul.f32 0.03125, %v1258_v9 }
 0x70d   :  { %1866 = vrsqrt.f32 %v1261_v10  ;;  %v1262_v12 = vadd.f32 1e-05, %v1260_v11 }
 0x70f   :  { %1868 = vrsqrt.f32 %v1262_v12 }
 0x717   :  { %v1867_v13 = vpop.eup %1866 }
 0x718   :  { %v1265_v15 = vmul.f32 %v1867_v13, %v1249_v57 }
 0x719   :  { %v1869_v17 = vpop.eup %1868 }
 0x71a   :  { %v1273_v18 = vmul.f32 %v1544_v14, %v1265_v15  ;;  %v1266_v19 = vmul.f32 %v1869_v17, %v1250_v59 }
 0x71c   :  { %v1274_v21 = vmul.f32 %v1544_v14, %v1266_v19  ;;  %v1281_v22 = vadd.f32 %v1545_v20, %v1273_v18 }
 0x71e   :  { %v1282_v16 = vadd.f32 %v1545_v20, %v1274_v21 }
 0x720   :  { %v1283_v25 = vpack.c.bf16 %v1282_v16, %v1281_v22 }
 0x722   :  { %1739 = vmatmul.mubr.msk.bf16.vlgmr.msra.gmra.mrb[44].mxu1 %vm82_vm1, %v1283_v25 }
 0x7f5   :  { %v1344_v52 = vpop.f32.mrb[44].mxu1 }
 0x7f6   :  { %v1345_v28 = vadd.f32 %v1546_v53, %v1344_v52  ;;  %v1740_v29 = vpop.f32.mrb[45].mxu1 }
 0x7f7   :  { %v1347_v30 = vpop.f32.mrb[46].mxu1 }
 0x7f8   :  { %v1348_v33 = vadd.f32 %v1546_v53, %v1347_v30  ;;  %v1741_v32 = vpop.f32.mrb[47].mxu1  ;;  %v1351_v31 = vmax.f32 %v1345_v28, 0.0 }
 0x7fa   :  { %v1352_v23 = vmax.f32 %v1348_v33, 0.0 }
 0x7fc   :  { %v1353_v35 = vpack.c.bf16 %v1352_v23, %v1351_v31 }
 0x7fe   :  { %1759 = vmatmul.mubr.bf16.vlgmr.msra.gmra.mrb[32].mxu0 %v1353_v35 }
 0x8d1   :  { %v1459_v36 = vpop.f32.mrb[32].mxu0 }
 0x8d2   :  { %v1460_v34 = vadd.f32 %v1550_v0, %v1459_v36  ;;  %v1760_v24 = vpop.f32.mrb[33].mxu0 }
 0x8d3   :  { %v1462_v37 = vpop.f32.mrb[34].mxu0 }
 0x8d4   :  { %v1463_v38 = vadd.f32 %v1550_v0, %v1462_v37  ;;  %v1761_v39 = vpop.f32.mrb[35].mxu0  ;;  %v1466_v42 = vadd.f32 %v1460_v34, %v1281_v22 }
 0x8d6   :  { %v1470_v43 = vsel %vm82_vm1, %v1466_v42, 0.0  ;;  %v1467_v44 = vadd.f32 %v1463_v38, %v1282_v16 }
 0x8d7   :  { %1471 = vadd.xlane.f32.xlu0 %v1470_v43 }
 0x8d8   :  { %v1473_v45 = vsel %vm82_vm1, %v1467_v44, 0.0 }
 0x8d9   :  { %1474 = vadd.xlane.f32.xlu1 %v1473_v45 }
 0x964   :  { %v1472_v46 = vpop.xlane.xlu0 %1471 }
 0x965   :  { %v1476_v47 = vmul.f32 0.03125, %v1472_v46 }
 0x966   :  { %v1475_v48 = vpop.xlane.xlu1 %1474 }
 0x967   :  { %v1478_v49 = vsub.f32 %v1466_v42, %v1476_v47  ;;  %v1477_v50 = vmul.f32 0.03125, %v1475_v48 }
 0x969   :  { %v1479_v51 = vsub.f32 %v1467_v44, %v1477_v50  ;;  %v1480_v54 = vmul.f32 %v1478_v49, %v1478_v49 }
 0x96b   :  { %v1482_v55 = vsel %vm82_vm1, %v1480_v54, 0.0  ;;  %v1481_v56 = vmul.f32 %v1479_v51, %v1479_v51 }
 0x96c   :  { %1483 = vadd.xlane.f32.xlu0 %v1482_v55 }
 0x96d   :  { %v1485_v57 = vsel %vm82_vm1, %v1481_v56, 0.0 }
 0x96e   :  { %1486 = vadd.xlane.f32.xlu1 %v1485_v57 }
 0x9f9   :  { %v1484_v58 = vpop.xlane.xlu0 %1483 }
 0x9fa   :  { %v1488_v59 = vmul.f32 0.03125, %v1484_v58 }
 0x9fb   :  { %v1487_v60 = vpop.xlane.xlu1 %1486 }
 0x9fc   :  { %v1490_v41 = vadd.f32 1e-05, %v1488_v59  ;;  %v1489_v40 = vmul.f32 0.03125, %v1487_v60 }
 0x9fe   :  { %1870 = vrsqrt.f32 %v1490_v41  ;;  %v1491_v3 = vadd.f32 1e-05, %v1489_v40 }
 0xa00   :  { %1872 = vrsqrt.f32 %v1491_v3 }
 0xa08   :  { %v1871_v4 = vpop.eup %1870 }
 0xa09   :  { %v1494_v62 = vmul.f32 %v1871_v4, %v1478_v49 }
 0xa0a   :  { %v1873_v63 = vpop.eup %1872 }
 0xa0b   :  { %v1502_v2 = vmul.f32 %v1559_v61, %v1494_v62  ;;  %v1495_v5 = vmul.f32 %v1873_v63, %v1479_v51 }
 0xa0d   :  { %v1510_v6 = vadd.f32 %v1560_v1, %v1502_v2  ;;  %v1503_v7 = vmul.f32 %v1559_v61, %v1495_v5 }
 0xa0f   :  { %1512 = vst.msk [vmem:[%s2292_s15] sm:$0xff] %vm82_vm1, %v1510_v6  ;;  %v1511_v8 = vadd.f32 %v1560_v1, %v1503_v7 }
 0xa11   :  { %1513 = vst.msk [vmem:[%s2292_s15 + $0x8] sm:$0xff] %vm82_vm1, %v1511_v8 }

</bundles_post_ra>
